<compile_context>
chip_gen: v5e
topology: v5e:2x2
jax: 0.10.0
libtpu: 0.0.40
codegen_flags: <defaults>
</compile_context>

<pallas_src>
import math
import functools

import jax
import jax.numpy as jnp
import numpy as np
from jax import lax
from jax.experimental import pallas as pl
from jax.experimental.pallas import tpu as pltpu


def _shifted_softplus(x):
    # F.softplus(x) - log(2)
    return jax.nn.softplus(x) - jnp.log(2.0)


def _schnet_interaction_kernel(
    x_ref, r_ref, nbr_ref, mask_ref, f_ref, g_ref,
    wf1_ref, bf1_ref, wf2_ref, bf2_ref,
    win2f_ref, wf2out_ref, bf2out_ref, wdense_ref, bdense_ref,
    out_ref, *, cutoff, na, nnbh, bt):
    rows = bt * na * nnbh        # per-neighbor rows in this batch tile
    natoms = bt * na             # atoms in this batch tile

    # ---- filter-generating network on expanded distances f_ij ----
    f2d = f_ref[...]                                                   # (rows, S)
    h = _shifted_softplus(
        jnp.dot(f2d, wf1_ref[...], preferred_element_type=jnp.float32)
        + bf1_ref[...])
    w_flt = (jnp.dot(h, wf2_ref[...], preferred_element_type=jnp.float32)
             + bf2_ref[...])                                           # (rows, F)

    # ---- cosine cutoff * neighbor mask folded into one (rows,1) factor ----
    r = r_ref[...]                                                     # (rows, 1)
    c = 0.5 * (jnp.cos(r * (math.pi / cutoff)) + 1.0)
    cm = jnp.where(r < cutoff, c, 0.0) * mask_ref[...]                 # (rows, 1)
    w_flt = w_flt * cm                                                 # one broadcast mul

    # ---- in2f: project atom features to filter space (no bias) ----
    y = jnp.dot(x_ref[...], win2f_ref[...],
                preferred_element_type=jnp.float32)                    # (natoms, F)

    # ---- neighbor gather via one-hot matmul (MXU-friendly gather) ----
    nbr = nbr_ref[...]                                                 # (rows, 1) int32
    if bt > 1:
        # offset neighbor index by the local batch element within this tile
        row_batch = lax.broadcasted_iota(jnp.int32, (rows, 1), 0) // (na * nnbh)
        nbr = nbr + row_batch * na
    atom_ids = lax.broadcasted_iota(jnp.int32, (rows, natoms), 1)
    onehot = (nbr == atom_ids).astype(jnp.float32)                     # (rows, natoms)
    y_g = jnp.dot(onehot, y, preferred_element_type=jnp.float32)       # (rows, F)

    # ---- continuous-filter convolution: multiply, aggregate (MXU segment-sum) ----
    y_w = y_g * w_flt                                                  # (rows, F)
    agg = jnp.dot(g_ref[...], y_w, preferred_element_type=jnp.float32) # (natoms, F)

    # ---- f2out (Dense + shifted_softplus) ----
    v = _shifted_softplus(
        jnp.dot(agg, wf2out_ref[...], preferred_element_type=jnp.float32)
        + bf2out_ref[...])                                             # (natoms, A)

    # ---- final Dense (bias, no activation), lane-dense padded output ----
    out_ref[...] = (
        jnp.dot(v, wdense_ref[...], preferred_element_type=jnp.float32)
        + bdense_ref[...])                                             # (natoms, A_pad)


def schnet_interaction(x, r_ij, neighbors, neighbor_mask, f_ij, params, cutoff,
                       batch_tile=None):
    nb, na, nab = x.shape
    nnbh = r_ij.shape[2]
    s_basis = f_ij.shape[3]
    nflt = params["win2f"].shape[1]

    # ---- batch tile: biggest divisor of nb that keeps grid length >= 2 ----
    if batch_tile is None:
        batch_tile = 1
        for cand in range(nb // 2, 0, -1):
            if nb % cand == 0:
                batch_tile = cand
                break
    bt = batch_tile
    assert nb % bt == 0, "batch_tile must divide the batch size"
    rows_tile = bt * na * nnbh
    atoms_tile = bt * na
    assert rows_tile % 8 == 0 or rows_tile == nb * na * nnbh, \
        "bt*na*nnbh must be a multiple of 8 (sublane tiling)"
    assert atoms_tile % 8 == 0 or atoms_tile == nb * na, \
        "bt*na must be a multiple of 8 (sublane tiling)"

    # ---- lane-dense output: pad final Dense output dim to a multiple of 128 ----
    nab_pad = ((nab + 127) // 128) * 128
    wdense_p = jnp.pad(params["wdense"], ((0, 0), (0, nab_pad - nab)))
    bdense_p = jnp.pad(params["bdense"], ((0, 0), (0, nab_pad - nab)))

    # ---- wrapper-side flattening: no in-kernel reshapes ----
    x2d = x.reshape(nb * na, nab)
    f2d = f_ij.reshape(nb * na * nnbh, s_basis)
    r2d = r_ij.reshape(nb * na * nnbh, 1)
    nbr2d = neighbors.reshape(nb * na * nnbh, 1).astype(jnp.int32)
    m2d = neighbor_mask.reshape(nb * na * nnbh, 1)

    # constant segment-sum matrix G: G[i, r] = 1 iff row r belongs to atom i
    g_np = (np.arange(rows_tile)[None, :] // nnbh
            == np.arange(atoms_tile)[:, None]).astype(np.float32)
    g_mat = jnp.asarray(g_np)                                          # (atoms_tile, rows_tile)

    inputs = (x2d, r2d, nbr2d, m2d, f2d, g_mat,
              params["wf1"], params["bf1"], params["wf2"], params["bf2"],
              params["win2f"], params["wf2out"], params["bf2out"],
              wdense_p, bdense_p)

    # ---- advisory cost estimate ----
    flops = int(
        2 * nb * na * nnbh * (s_basis * nflt + nflt * nflt + 2 * atoms_tile * nflt)
        + 2 * nb * na * (nab * nflt + nflt * nab + nab * nab_pad))
    transcendentals = int(nb * na * nnbh * (nflt + 1) + nb * na * nab)
    bytes_accessed = int(sum(a.size * a.dtype.itemsize for a in inputs)
                         + nb * na * nab_pad * 4)

    grid = (nb // bt,)
    full = lambda shape: pl.BlockSpec(shape, lambda b: (0,) * len(shape))

    out2d = pl.pallas_call(
        functools.partial(_schnet_interaction_kernel,
                          cutoff=cutoff, na=na, nnbh=nnbh, bt=bt),
        out_shape=jax.ShapeDtypeStruct((nb * na, nab_pad), jnp.float32),
        grid_spec=pltpu.PrefetchScalarGridSpec(
            num_scalar_prefetch=0,
            grid=grid,
            in_specs=[
                pl.BlockSpec((atoms_tile, nab), lambda b: (b, 0)),      # x
                pl.BlockSpec((rows_tile, 1), lambda b: (b, 0)),         # r_ij
                pl.BlockSpec((rows_tile, 1), lambda b: (b, 0)),         # neighbors
                pl.BlockSpec((rows_tile, 1), lambda b: (b, 0)),         # neighbor_mask
                pl.BlockSpec((rows_tile, s_basis), lambda b: (b, 0)),   # f_ij
                full((atoms_tile, rows_tile)),                          # G (segment-sum)
                full((s_basis, nflt)),   # wf1
                full((1, nflt)),         # bf1
                full((nflt, nflt)),      # wf2
                full((1, nflt)),         # bf2
                full((nab, nflt)),       # win2f
                full((nflt, nab)),       # wf2out
                full((1, nab)),          # bf2out
                full((nab, nab_pad)),    # wdense (lane-padded)
                full((1, nab_pad)),      # bdense (lane-padded)
            ],
            out_specs=pl.BlockSpec((atoms_tile, nab_pad), lambda b: (b, 0)),
        ),
        compiler_params=pltpu.CompilerParams(
            dimension_semantics=("parallel",)),
        cost_estimate=pl.CostEstimate(flops=flops,
                                      transcendentals=transcendentals,
                                      bytes_accessed=bytes_accessed),
    )(*inputs)

    # drop the lane padding and restore (N_b, N_a, n_atom_basis)
    return out2d.reshape(nb, na, nab_pad)[..., :nab]


def reference(x, r_ij, neighbors, neighbor_mask, f_ij, params, cutoff):
    """Pure-JAX reference of the same forward pass (for verification)."""
    nb, na, _ = x.shape
    nnbh = r_ij.shape[2]
    h = _shifted_softplus(f_ij @ params["wf1"] + params["bf1"][0])
    w_flt = h @ params["wf2"] + params["bf2"][0]
    c = 0.5 * (jnp.cos(r_ij * jnp.pi / cutoff) + 1.0)
    c = c * (r_ij < cutoff).astype(jnp.float32)
    w_flt = w_flt * c[..., None]
    y = x @ params["win2f"]
    nbh = neighbors.reshape(nb, na * nnbh)
    y_g = jax.vmap(lambda yy, nn: yy[nn])(y, nbh).reshape(nb, na, nnbh, -1)
    y_w = y_g * w_flt * neighbor_mask[..., None]
    agg = y_w.sum(axis=2)
    v = _shifted_softplus(agg @ params["wf2out"] + params["bf2out"][0])
    return v @ params["wdense"] + params["bdense"][0]


if __name__ == "__main__":
    # small, module-consistent shapes
    N_b, N_a, N_nbh = 2, 8, 8
    n_atom_basis, n_spatial_basis, n_filters = 32, 16, 32
    cutoff = 5.0

    key = jax.random.PRNGKey(0)
    keys = jax.random.split(key, 16)

    # deterministic synthetic parameters (Dense: y = x @ W + b)
    params = {
        "wf1":    0.1 * jax.random.normal(keys[0], (n_spatial_basis, n_filters), jnp.float32),
        "bf1":    0.1 * jax.random.normal(keys[1], (1, n_filters), jnp.float32),
        "wf2":    0.1 * jax.random.normal(keys[2], (n_filters, n_filters), jnp.float32),
        "bf2":    0.1 * jax.random.normal(keys[3], (1, n_filters), jnp.float32),
        "win2f":  0.1 * jax.random.normal(keys[4], (n_atom_basis, n_filters), jnp.float32),
        "wf2out": 0.1 * jax.random.normal(keys[5], (n_filters, n_atom_basis), jnp.float32),
        "bf2out": 0.1 * jax.random.normal(keys[6], (1, n_atom_basis), jnp.float32),
        "wdense": 0.1 * jax.random.normal(keys[7], (n_atom_basis, n_atom_basis), jnp.float32),
        "bdense": 0.1 * jax.random.normal(keys[8], (1, n_atom_basis), jnp.float32),
    }

    # inputs
    x = jax.random.normal(keys[9], (N_b, N_a, n_atom_basis), jnp.float32)
    r_ij = jax.random.uniform(keys[10], (N_b, N_a, N_nbh), jnp.float32,
                              minval=0.5, maxval=6.0)
    neighbors = jax.random.randint(keys[11], (N_b, N_a, N_nbh), 0, N_a, jnp.int32)
    neighbor_mask = (jax.random.uniform(keys[12], (N_b, N_a, N_nbh)) > 0.2
                     ).astype(jnp.float32)
    f_ij = jax.random.normal(keys[13], (N_b, N_a, N_nbh, n_spatial_basis), jnp.float32)

    out = schnet_interaction(x, r_ij, neighbors, neighbor_mask, f_ij, params, cutoff)
    out = jax.block_until_ready(out)

    ref = reference(x, r_ij, neighbors, neighbor_mask, f_ij, params, cutoff)
    np.testing.assert_allclose(np.asarray(out), np.asarray(ref), rtol=1e-4, atol=1e-4)

    print("KERNEL_OK")
</pallas_src>

<mosaic_0001>
module attributes {stable_mosaic.version = 11 : i64} {
  func.func @_schnet_interaction_kernel(%arg0: i32, %arg1: memref<8x32xf32, #tpu.memory_space<vmem>>, %arg2: memref<64x1xf32, #tpu.memory_space<vmem>>, %arg3: memref<64x1xi32, #tpu.memory_space<vmem>>, %arg4: memref<64x1xf32, #tpu.memory_space<vmem>>, %arg5: memref<64x16xf32, #tpu.memory_space<vmem>>, %arg6: memref<8x64xf32, #tpu.memory_space<vmem>>, %arg7: memref<16x32xf32, #tpu.memory_space<vmem>>, %arg8: memref<1x32xf32, #tpu.memory_space<vmem>>, %arg9: memref<32x32xf32, #tpu.memory_space<vmem>>, %arg10: memref<1x32xf32, #tpu.memory_space<vmem>>, %arg11: memref<32x32xf32, #tpu.memory_space<vmem>>, %arg12: memref<32x32xf32, #tpu.memory_space<vmem>>, %arg13: memref<1x32xf32, #tpu.memory_space<vmem>>, %arg14: memref<32x128xf32, #tpu.memory_space<vmem>>, %arg15: memref<1x128xf32, #tpu.memory_space<vmem>>, %arg16: memref<8x128xf32, #tpu.memory_space<vmem>>) attributes {dimension_semantics = [#tpu.dimension_semantics<parallel>], iteration_bounds = array<i64: 2>, scalar_prefetch = 0 : i64, scratch_operands = 0 : i64, tpu.core_type = #tpu.core_type<tc>, window_params = [{transform_indices = @transform_0, window_bounds = array<i64: 8, 32>}, {transform_indices = @transform_1, window_bounds = array<i64: 64, 1>}, {transform_indices = @transform_2, window_bounds = array<i64: 64, 1>}, {transform_indices = @transform_3, window_bounds = array<i64: 64, 1>}, {transform_indices = @transform_4, window_bounds = array<i64: 64, 16>}, {pipeline_mode = #tpu.pipeline_mode<synchronous>, transform_indices = @transform_5, window_bounds = array<i64: 8, 64>}, {pipeline_mode = #tpu.pipeline_mode<synchronous>, transform_indices = @transform_6, window_bounds = array<i64: 16, 32>}, {pipeline_mode = #tpu.pipeline_mode<synchronous>, transform_indices = @transform_7, window_bounds = array<i64: 1, 32>}, {pipeline_mode = #tpu.pipeline_mode<synchronous>, transform_indices = @transform_8, window_bounds = array<i64: 32, 32>}, {pipeline_mode = #tpu.pipeline_mode<synchronous>, transform_indices = @transform_9, window_bounds = array<i64: 1, 32>}, {pipeline_mode = #tpu.pipeline_mode<synchronous>, transform_indices = @transform_10, window_bounds = array<i64: 32, 32>}, {pipeline_mode = #tpu.pipeline_mode<synchronous>, transform_indices = @transform_11, window_bounds = array<i64: 32, 32>}, {pipeline_mode = #tpu.pipeline_mode<synchronous>, transform_indices = @transform_12, window_bounds = array<i64: 1, 32>}, {pipeline_mode = #tpu.pipeline_mode<synchronous>, transform_indices = @transform_13, window_bounds = array<i64: 32, 128>}, {pipeline_mode = #tpu.pipeline_mode<synchronous>, transform_indices = @transform_14, window_bounds = array<i64: 1, 128>}, {transform_indices = @transform_15, window_bounds = array<i64: 8, 128>}]} {
    %c0 = arith.constant 0 : index
    %c0_0 = arith.constant 0 : index
    %0 = vector.load %arg5[%c0, %c0_0] : memref<64x16xf32, #tpu.memory_space<vmem>>, vector<64x16xf32>
    %c0_1 = arith.constant 0 : index
    %c0_2 = arith.constant 0 : index
    %1 = vector.load %arg7[%c0_1, %c0_2] : memref<16x32xf32, #tpu.memory_space<vmem>>, vector<16x32xf32>
    %cst = arith.constant dense<0.000000e+00> : vector<64x32xf32>
    %2 = tpu.matmul %0, %1, %cst {dimension_numbers = #tpu.dot_dimension_numbers<[1], [0], [0], [1], [0, 0, 1, 1], [], []>} : vector<64x16xf32>, vector<16x32xf32>, vector<64x32xf32> -> vector<64x32xf32>
    %c0_3 = arith.constant 0 : index
    %c0_4 = arith.constant 0 : index
    %3 = vector.load %arg8[%c0_3, %c0_4] : memref<1x32xf32, #tpu.memory_space<vmem>>, vector<1x32xf32>
    %4 = vector.broadcast %3 : vector<1x32xf32> to vector<64x32xf32>
    %5 = arith.addf %2, %4 : vector<64x32xf32>
    %cst_5 = arith.constant 0.000000e+00 : f32
    %6 = vector.broadcast %cst_5 : f32 to vector<64x32xf32>
    %7 = arith.maximumf %5, %6 : vector<64x32xf32>
    %8 = vector.broadcast %cst_5 : f32 to vector<64x32xf32>
    %9 = arith.subf %5, %8 : vector<64x32xf32>
    %10 = arith.cmpf one, %9, %9 : vector<64x32xf32>
    %11 = vector.broadcast %cst_5 : f32 to vector<64x32xf32>
    %12 = arith.addf %5, %11 : vector<64x32xf32>
    %13 = math.absf %9 : vector<64x32xf32>
    %cst_6 = arith.constant 0.000000e+00 : f32
    %14 = vector.broadcast %cst_6 : f32 to vector<64x32xf32>
    %15 = arith.subf %14, %13 : vector<64x32xf32>
    %16 = math.exp %15 : vector<64x32xf32>
    %17 = math.log1p %16 : vector<64x32xf32>
    %18 = arith.addf %7, %17 : vector<64x32xf32>
    %19 = arith.select %10, %12, %18 : vector<64x32xi1>, vector<64x32xf32>
    %cst_7 = arith.constant 2.000000e+00 : f32
    %20 = math.log %cst_7 : f32
    %21 = vector.broadcast %20 : f32 to vector<64x32xf32>
    %22 = arith.subf %19, %21 : vector<64x32xf32>
    %c0_8 = arith.constant 0 : index
    %c0_9 = arith.constant 0 : index
    %23 = vector.load %arg9[%c0_8, %c0_9] : memref<32x32xf32, #tpu.memory_space<vmem>>, vector<32x32xf32>
    %cst_10 = arith.constant dense<0.000000e+00> : vector<64x32xf32>
    %24 = tpu.matmul %22, %23, %cst_10 {dimension_numbers = #tpu.dot_dimension_numbers<[1], [0], [0], [1], [0, 0, 1, 1], [], []>} : vector<64x32xf32>, vector<32x32xf32>, vector<64x32xf32> -> vector<64x32xf32>
    %c0_11 = arith.constant 0 : index
    %c0_12 = arith.constant 0 : index
    %25 = vector.load %arg10[%c0_11, %c0_12] : memref<1x32xf32, #tpu.memory_space<vmem>>, vector<1x32xf32>
    %26 = vector.broadcast %25 : vector<1x32xf32> to vector<64x32xf32>
    %27 = arith.addf %24, %26 : vector<64x32xf32>
    %c0_13 = arith.constant 0 : index
    %c0_14 = arith.constant 0 : index
    %28 = vector.load %arg2[%c0_13, %c0_14] : memref<64x1xf32, #tpu.memory_space<vmem>>, vector<64x1xf32>
    %cst_15 = arith.constant 0.628318548 : f32
    %29 = vector.broadcast %cst_15 : f32 to vector<64x1xf32>
    %30 = arith.mulf %28, %29 : vector<64x1xf32>
    %31 = math.cos %30 : vector<64x1xf32>
    %cst_16 = arith.constant 1.000000e+00 : f32
    %32 = vector.broadcast %cst_16 : f32 to vector<64x1xf32>
    %33 = arith.addf %31, %32 : vector<64x1xf32>
    %cst_17 = arith.constant 5.000000e-01 : f32
    %34 = vector.broadcast %cst_17 : f32 to vector<64x1xf32>
    %35 = arith.mulf %34, %33 : vector<64x1xf32>
    %cst_18 = arith.constant 5.000000e+00 : f32
    %36 = vector.broadcast %cst_18 : f32 to vector<64x1xf32>
    %37 = arith.cmpf olt, %28, %36 : vector<64x1xf32>
    %cst_19 = arith.constant 0.000000e+00 : f32
    %38 = vector.broadcast %cst_19 : f32 to vector<64x1xf32>
    %39 = arith.select %37, %35, %38 : vector<64x1xi1>, vector<64x1xf32>
    %c0_20 = arith.constant 0 : index
    %c0_21 = arith.constant 0 : index
    %40 = vector.load %arg4[%c0_20, %c0_21] : memref<64x1xf32, #tpu.memory_space<vmem>>, vector<64x1xf32>
    %41 = arith.mulf %39, %40 : vector<64x1xf32>
    %42 = vector.broadcast %41 : vector<64x1xf32> to vector<64x32xf32>
    %43 = arith.mulf %27, %42 : vector<64x32xf32>
    %c0_22 = arith.constant 0 : index
    %c0_23 = arith.constant 0 : index
    %44 = vector.load %arg1[%c0_22, %c0_23] : memref<8x32xf32, #tpu.memory_space<vmem>>, vector<8x32xf32>
    %c0_24 = arith.constant 0 : index
    %c0_25 = arith.constant 0 : index
    %45 = vector.load %arg11[%c0_24, %c0_25] : memref<32x32xf32, #tpu.memory_space<vmem>>, vector<32x32xf32>
    %cst_26 = arith.constant dense<0.000000e+00> : vector<8x32xf32>
    %46 = tpu.matmul %44, %45, %cst_26 {dimension_numbers = #tpu.dot_dimension_numbers<[1], [0], [0], [1], [0, 0, 1, 1], [], []>} : vector<8x32xf32>, vector<32x32xf32>, vector<8x32xf32> -> vector<8x32xf32>
    %c0_27 = arith.constant 0 : index
    %c0_28 = arith.constant 0 : index
    %47 = vector.load %arg3[%c0_27, %c0_28] : memref<64x1xi32, #tpu.memory_space<vmem>>, vector<64x1xi32>
    %48 = tpu.iota {dimensions = array<i32: 1>} : vector<64x8xi32>
    %49 = vector.broadcast %47 : vector<64x1xi32> to vector<64x8xi32>
    %50 = arith.cmpi eq, %49, %48 : vector<64x8xi32>
    %51 = arith.extui %50 : vector<64x8xi1> to vector<64x8xi32>
    %52 = arith.sitofp %51 : vector<64x8xi32> to vector<64x8xf32>
    %cst_29 = arith.constant dense<0.000000e+00> : vector<64x32xf32>
    %53 = tpu.matmul %52, %46, %cst_29 {dimension_numbers = #tpu.dot_dimension_numbers<[1], [0], [0], [1], [0, 0, 1, 1], [], []>} : vector<64x8xf32>, vector<8x32xf32>, vector<64x32xf32> -> vector<64x32xf32>
    %54 = arith.mulf %53, %43 : vector<64x32xf32>
    %c0_30 = arith.constant 0 : index
    %c0_31 = arith.constant 0 : index
    %55 = vector.load %arg6[%c0_30, %c0_31] : memref<8x64xf32, #tpu.memory_space<vmem>>, vector<8x64xf32>
    %cst_32 = arith.constant dense<0.000000e+00> : vector<8x32xf32>
    %56 = tpu.matmul %55, %54, %cst_32 {dimension_numbers = #tpu.dot_dimension_numbers<[1], [0], [0], [1], [0, 0, 1, 1], [], []>} : vector<8x64xf32>, vector<64x32xf32>, vector<8x32xf32> -> vector<8x32xf32>
    %c0_33 = arith.constant 0 : index
    %c0_34 = arith.constant 0 : index
    %57 = vector.load %arg12[%c0_33, %c0_34] : memref<32x32xf32, #tpu.memory_space<vmem>>, vector<32x32xf32>
    %cst_35 = arith.constant dense<0.000000e+00> : vector<8x32xf32>
    %58 = tpu.matmul %56, %57, %cst_35 {dimension_numbers = #tpu.dot_dimension_numbers<[1], [0], [0], [1], [0, 0, 1, 1], [], []>} : vector<8x32xf32>, vector<32x32xf32>, vector<8x32xf32> -> vector<8x32xf32>
    %c0_36 = arith.constant 0 : index
    %c0_37 = arith.constant 0 : index
    %59 = vector.load %arg13[%c0_36, %c0_37] : memref<1x32xf32, #tpu.memory_space<vmem>>, vector<1x32xf32>
    %60 = vector.broadcast %59 : vector<1x32xf32> to vector<8x32xf32>
    %61 = arith.addf %58, %60 : vector<8x32xf32>
    %cst_38 = arith.constant 0.000000e+00 : f32
    %62 = vector.broadcast %cst_38 : f32 to vector<8x32xf32>
    %63 = arith.maximumf %61, %62 : vector<8x32xf32>
    %64 = vector.broadcast %cst_38 : f32 to vector<8x32xf32>
    %65 = arith.subf %61, %64 : vector<8x32xf32>
    %66 = arith.cmpf one, %65, %65 : vector<8x32xf32>
    %67 = vector.broadcast %cst_38 : f32 to vector<8x32xf32>
    %68 = arith.addf %61, %67 : vector<8x32xf32>
    %69 = math.absf %65 : vector<8x32xf32>
    %cst_39 = arith.constant 0.000000e+00 : f32
    %70 = vector.broadcast %cst_39 : f32 to vector<8x32xf32>
    %71 = arith.subf %70, %69 : vector<8x32xf32>
    %72 = math.exp %71 : vector<8x32xf32>
    %73 = math.log1p %72 : vector<8x32xf32>
    %74 = arith.addf %63, %73 : vector<8x32xf32>
    %75 = arith.select %66, %68, %74 : vector<8x32xi1>, vector<8x32xf32>
    %cst_40 = arith.constant 2.000000e+00 : f32
    %76 = math.log %cst_40 : f32
    %77 = vector.broadcast %76 : f32 to vector<8x32xf32>
    %78 = arith.subf %75, %77 : vector<8x32xf32>
    %c0_41 = arith.constant 0 : index
    %c0_42 = arith.constant 0 : index
    %79 = vector.load %arg14[%c0_41, %c0_42] : memref<32x128xf32, #tpu.memory_space<vmem>>, vector<32x128xf32>
    %cst_43 = arith.constant dense<0.000000e+00> : vector<8x128xf32>
    %80 = tpu.matmul %78, %79, %cst_43 {dimension_numbers = #tpu.dot_dimension_numbers<[1], [0], [0], [1], [0, 0, 1, 1], [], []>} : vector<8x32xf32>, vector<32x128xf32>, vector<8x128xf32> -> vector<8x128xf32>
    %c0_44 = arith.constant 0 : index
    %c0_45 = arith.constant 0 : index
    %81 = vector.load %arg15[%c0_44, %c0_45] : memref<1x128xf32, #tpu.memory_space<vmem>>, vector<1x128xf32>
    %82 = vector.broadcast %81 : vector<1x128xf32> to vector<8x128xf32>
    %83 = arith.addf %80, %82 : vector<8x128xf32>
    %c0_46 = arith.constant 0 : index
    %c0_47 = arith.constant 0 : index
    %84 = vector.load %arg16[%c0_46, %c0_47] : memref<8x128xf32, #tpu.memory_space<vmem>>, vector<8x128xf32>
    tpu.vector_store %arg16[%c0_46, %c0_47], %83 {strides = array<i32>} : memref<8x128xf32, #tpu.memory_space<vmem>>, vector<8x128xf32>,
    return
  }
  func.func @transform_0(%arg0: i32) -> (i32, i32) {
    %c0_i32 = arith.constant 0 : i32
    %c0_i32_0 = arith.constant 0 : i32
    return %arg0, %c0_i32 : i32, i32
  }
  func.func @transform_1(%arg0: i32) -> (i32, i32) {
    %c0_i32 = arith.constant 0 : i32
    %c0_i32_0 = arith.constant 0 : i32
    return %arg0, %c0_i32 : i32, i32
  }
  func.func @transform_2(%arg0: i32) -> (i32, i32) {
    %c0_i32 = arith.constant 0 : i32
    %c0_i32_0 = arith.constant 0 : i32
    return %arg0, %c0_i32 : i32, i32
  }
  func.func @transform_3(%arg0: i32) -> (i32, i32) {
    %c0_i32 = arith.constant 0 : i32
    %c0_i32_0 = arith.constant 0 : i32
    return %arg0, %c0_i32 : i32, i32
  }
  func.func @transform_4(%arg0: i32) -> (i32, i32) {
    %c0_i32 = arith.constant 0 : i32
    %c0_i32_0 = arith.constant 0 : i32
    return %arg0, %c0_i32 : i32, i32
  }
  func.func @transform_5(%arg0: i32) -> (i32, i32) {
    %c0_i32 = arith.constant 0 : i32
    %c0_i32_0 = arith.constant 0 : i32
    %c0_i32_1 = arith.constant 0 : i32
    return %c0_i32, %c0_i32_0 : i32, i32
  }
  func.func @transform_6(%arg0: i32) -> (i32, i32) {
    %c0_i32 = arith.constant 0 : i32
    %c0_i32_0 = arith.constant 0 : i32
    %c0_i32_1 = arith.constant 0 : i32
    return %c0_i32, %c0_i32_0 : i32, i32
  }
  func.func @transform_7(%arg0: i32) -> (i32, i32) {
    %c0_i32 = arith.constant 0 : i32
    %c0_i32_0 = arith.constant 0 : i32
    %c0_i32_1 = arith.constant 0 : i32
    return %c0_i32, %c0_i32_0 : i32, i32
  }
  func.func @transform_8(%arg0: i32) -> (i32, i32) {
    %c0_i32 = arith.constant 0 : i32
    %c0_i32_0 = arith.constant 0 : i32
    %c0_i32_1 = arith.constant 0 : i32
    return %c0_i32, %c0_i32_0 : i32, i32
  }
  func.func @transform_9(%arg0: i32) -> (i32, i32) {
    %c0_i32 = arith.constant 0 : i32
    %c0_i32_0 = arith.constant 0 : i32
    %c0_i32_1 = arith.constant 0 : i32
    return %c0_i32, %c0_i32_0 : i32, i32
  }
  func.func @transform_10(%arg0: i32) -> (i32, i32) {
    %c0_i32 = arith.constant 0 : i32
    %c0_i32_0 = arith.constant 0 : i32
    %c0_i32_1 = arith.constant 0 : i32
    return %c0_i32, %c0_i32_0 : i32, i32
  }
  func.func @transform_11(%arg0: i32) -> (i32, i32) {
    %c0_i32 = arith.constant 0 : i32
    %c0_i32_0 = arith.constant 0 : i32
    %c0_i32_1 = arith.constant 0 : i32
    return %c0_i32, %c0_i32_0 : i32, i32
  }
  func.func @transform_12(%arg0: i32) -> (i32, i32) {
    %c0_i32 = arith.constant 0 : i32
    %c0_i32_0 = arith.constant 0 : i32
    %c0_i32_1 = arith.constant 0 : i32
    return %c0_i32, %c0_i32_0 : i32, i32
  }
  func.func @transform_13(%arg0: i32) -> (i32, i32) {
    %c0_i32 = arith.constant 0 : i32
    %c0_i32_0 = arith.constant 0 : i32
    %c0_i32_1 = arith.constant 0 : i32
    return %c0_i32, %c0_i32_0 : i32, i32
  }
  func.func @transform_14(%arg0: i32) -> (i32, i32) {
    %c0_i32 = arith.constant 0 : i32
    %c0_i32_0 = arith.constant 0 : i32
    %c0_i32_1 = arith.constant 0 : i32
    return %c0_i32, %c0_i32_0 : i32, i32
  }
  func.func @transform_15(%arg0: i32) -> (i32, i32) {
    %c0_i32 = arith.constant 0 : i32
    %c0_i32_0 = arith.constant 0 : i32
    return %arg0, %c0_i32 : i32, i32
  }
}

</mosaic_0001>

<bundles_post_ra>
// kernel: tpu_custom_call.1
= control target key start
LH: loop header
LB: loop body
LE: loop exit
PB: predicated region body
PF: predicated region fallthrough
CT: control target
= control target key end

     0   :  { %s4302_s0 = inlined_call_operand.vmem [shape: f32[16,32], index: 0, kind: input, shape index: {}]   ;;  %s4303_s1 = inlined_call_operand.vmem [shape: f32[128,1], index: 1, kind: input, shape index: {}]   ;;  %s4304_s2 = inlined_call_operand.vmem [shape: s32[128,1], index: 2, kind: input, shape index: {}]   ;;  %s4305_s3 = inlined_call_operand.vmem [shape: f32[128,1], index: 3, kind: input, shape index: {}]   ;;  %s4306_s4 = inlined_call_operand.vmem [shape: f32[128,16], index: 4, kind: input, shape index: {}]   ;;  %s4307_s5 = inlined_call_operand.vmem [shape: f32[8,64], index: 5, kind: input, shape index: {}]   ;;  %s4308_s6 = inlined_call_operand.vmem [shape: f32[16,32], index: 6, kind: input, shape index: {}]   ;;  %s4309_s7 = inlined_call_operand.vmem [shape: f32[1,32], index: 7, kind: input, shape index: {}]   ;;  %s4310_s8 = inlined_call_operand.vmem [shape: f32[32,32], index: 8, kind: input, shape index: {}]   ;;  %s4311_s9 = inlined_call_operand.vmem [shape: f32[1,32], index: 9, kind: input, shape index: {}]   ;;  %s4312_s10 = inlined_call_operand.vmem [shape: f32[32,32], index: 10, kind: input, shape index: {}]   ;;  %s4313_s11 = inlined_call_operand.vmem [shape: f32[32,32], index: 11, kind: input, shape index: {}]   ;;  %s4314_s12 = inlined_call_operand.vmem [shape: f32[1,32], index: 12, kind: input, shape index: {}]   ;;  %s4315_s13 = inlined_call_operand.vmem [shape: f32[32,128], index: 13, kind: input, shape index: {}]   ;;  %s4316_s14 = inlined_call_operand.vmem [shape: f32[1,128], index: 14, kind: input, shape index: {}]   ;;  %s4317_s15 = inlined_call_operand.hbm [shape: f32[16,128], index: 15, kind: output, shape index: {}]  }
   0x1   :  { %4319 = sst [smem:[#allocation7_spill]] %s4302_s0 }
   0x2   :  { %4320 = sst [smem:[#allocation8_spill]] %s4303_s1 }
   0x3   :  { %4321 = sst [smem:[#allocation9_spill]] %s4304_s2 }
   0x4   :  { %4322 = sst [smem:[#allocation10_spill]] %s4305_s3 }
   0x5   :  { %4323 = sst [smem:[#allocation11_spill]] %s4306_s4 }
   0x6   :  { %20 = vsyncpa [#allocation3], 0 }
   0x7   :  { %22 = vsyncpa [#allocation3 + $0x1], 0  ;;  %s2955_s18 = smov 0   ;;  %s2957_s19 = smov 0  }
   0x8   :  { %s2959_s20 = smov 0   ;;  %s2961_s21 = smov 0  }
   0x9 LB: > { %4324 = sst [smem:[#allocation5_spill]] %s2861_s20  ;;  %s2976_s22 = sadd.s32 4294967295, %s2865_s21   ;;  %s2865_s21 = sphi %s2961_s21, %s4355_s21   ;;  %s2861_s20 = sphi %s2959_s20, %s4352_s20   ;;  %s2857_s19 = sphi %s2957_s19, %s4354_s19   ;;  %s2853_s18 = sphi %s2955_s18, %s4353_s18  }
   0xa   : > { %s2618_s23 = sadd.s32 4294967294, %s2865_s21   ;;  %s2980_s24 = sadd.s32 1, %s2865_s21  }
   0xb   : > { %s375_s25 = sadd.s32 1, %s2861_s20  ;;  %s372_s26 = ssub.s32 %s2865_s21, %s2980_s24 }
   0xc   : > { %p385_p0 = scmp.ne.s32.totalorder %s2861_s20, %s2857_s19  ;;  %p373_p1 = scmp.eq.s32.totalorder %s372_s26, 0 }
   0xd   : > { %p386_p2 = scmp.eq.s32.totalorder %s2976_s22, 1  ;;  %p391_p3 = scmp.ne.s32.totalorder %s2857_s19, %s2853_s18 }
   0xe   : > { %p392_p4 = scmp.eq.s32.totalorder %s2618_s23, 1  ;;  %p2621_p7 = scmp.ge.s32.totalorder %s2865_s21, 1 }
   0xf   : > { %s2991_s27 = scalar_select %p373_p1, %s2861_s20, %s375_s25  }
  0x10   : > { %p2993_p5 = por %p386_p2, %p385_p0  ;;  %p2997_p6 = por %p392_p4, %p391_p3 }
  0x11   : > { %4325 = sst [smem:[#allocation6_spill]] %s2991_s27  ;;  %p483_p8 = scmp.lt.s32.totalorder %s2865_s21, 3 }
  0x13   : > { %p484_p9 = pnand %p2621_p7, %p483_p8 }
  0x14   : > { %s3010_s25 = sshll.u32 (!%p484_p9), %s2976_s22, 3  ;;  %s4328_s4 = sld [smem:[#allocation11_spill]] (!%p484_p9) }
  0x15   : > { %487 = sbr.rel (%p484_p9) target bundleno = 1186 (0x4a2), region = 80  ;;  %p555_p10 = scmp.lt.s32.totalorder (!%p484_p9), %s3010_s25, 15 }
  0x16   : > { %s4329_s1 = sld [smem:[#allocation8_spill]] (!%p484_p9)  ;;  %p550_p11 = scmp.lt.s32.totalorder (!%p484_p9), %s2976_s22, 1 }
  0x17   : > { %s4332_s2 = sld [smem:[#allocation9_spill]] (!%p484_p9)  ;;  %s2823_s17 = scalar_lea.hbm (!%p484_p9), %s4317_s15, 16 }
  0x18   : > { %s4333_s3 = sld [smem:[#allocation10_spill]] (!%p484_p9) }
  0x19   : > { %s4350_s0 = sld [smem:[#allocation7_spill]] (!%p484_p9) }
  0x1a   : > { %v587_v0 = vld [vmem:[%s4308_s6 + $0x8] sm:$0xff]  ;;  %v586_v1 = vld [vmem:[%s4308_s6] sm:$0xff]  ;;  %s556_s26 = scalar_select %p555_p10, %s3010_s25, 15  ;;  %vm592_vm0 = vcmask 130048   ;;  %v2867_v22 = vmov 2102212464  }
  0x1b   : > { %631 = vmatpush.msra.mxu0 %v587_v0  ;;  %v2868_v26 = vmov 683565275   ;;  %v2869_v28 = vmov 2475754826   ;;  %v2870_v31 = vmov 2131351028  }
  0x1c   : > { %s3014_s27 = sshll.u32 %s556_s26, 3  ;;  %v2871_v37 = vmov 920167782   ;;  %v2872_v42 = vmov 1326507024   ;;  %s4357_s22 = smov (!%p550_p11, %s2976_s22), 1 }
  0x1d   : > { %632 = vmatpush.msra.mxu0 %v586_v1  ;;  %s3020_s20 = scalar_lea.vmem %s4328_s4, %s3014_s27  ;;  %s3031_s26 = scalar_lea.vmem %s4329_s1, %s3014_s27 }
  0x1e   : > { %v578_v2 = vld [vmem:[%s3020_s20] sm:$0xff]  ;;  %v579_v3 = vld [vmem:[%s3020_s20 + $0x8] sm:$0xff]  ;;  %v580_v4 = vld [vmem:[%s3020_s20 + $0x10] sm:$0xff]  ;;  %s3253_s16 = scalar_lea.vmem %s4332_s2, %s3014_s27  ;;  %s3352_s1 = scalar_lea.vmem %s4333_s3, %s3014_s27 }
  0x1f   : > { %2632 = vmatmul.msk.f32.vlgmr.msra.gmra.mxu0 %vm592_vm0, %v578_v2  ;;  %v3035_v5 = vld [vmem:[%s3031_s26 + $0x30] sm:$0xff]  ;;  %v581_v8 = vld [vmem:[%s3020_s20 + $0x18] sm:$0xff]  ;;  %v582_v15 = vld [vmem:[%s3020_s20 + $0x20] sm:$0xff]  ;;  %s2623_s30 = sshll.u32 %s4357_s22, 3 }
  0x20   : > { %v3038_v6 = vmul.f32 0.62831855, %v3035_v5  ;;  %v3044_v11 = vld [vmem:[%s3031_s26 + $0x18] sm:$0xff]  ;;  %v583_v34 = vld [vmem:[%s3020_s20 + $0x28] sm:$0xff]  ;;  %v584_v62 = vld [vmem:[%s3020_s20 + $0x30] sm:$0xff]  ;;  %s553_s23 = scalar_lea.vmem %s4350_s0, %s2623_s30 }
  0x21   : > { %v3047_v13 = vmul.f32 0.62831855, %v3044_v11 }
  0x22   : > { %v1827_v7 = vand.u32 2139095040, %v3038_v6  ;;  %v1824_v21 = vand.u32 2147483647, %v3038_v6 }
  0x23   : > { %v1365_v14 = vand.u32 2139095040, %v3047_v13  ;;  %v1362_v51 = vand.u32 2147483647, %v3047_v13 }
  0x24   : > { %v1828_v9 = vshrl.u32 %v1827_v7, 23  ;;  %v1831_v24 = vand.u32 8388607, %v1824_v21 }
  0x25   : > { %v1366_v18 = vshrl.u32 %v1365_v14, 23  ;;  %v3115_v1 = vand.u32 8388607, %v1362_v51 }
  0x26   : > { %v2674_v10 = vadd.s32 4294967169, %v1828_v9  ;;  %v1832_v35 = vor.u32 8388608, %v1831_v24 }
  0x27   : > { %2633 = vmatmul.msk.f32.gmra.mxu0 %vm592_vm0, %v579_v3  ;;  %v2665_v20 = vadd.s32 4294967169, %v1366_v18 }
  0x28   : > { %v1834_v12 = vadd.s32 1, %v2674_v10  ;;  %v3090_v48 = vshll.u32 %v1832_v35, 8 }
  0x29   : > { %v1372_v52 = vadd.s32 1, %v2665_v20 }
  0x2a   : > { %vm1835_vm1 = vcmp.gt.s32.totalorder %v1834_v12, 0  ;;  %v1873_v55 = vand.u32 65535, %v3090_v48  ;;  %v1874_v58 = vshrl.u32 %v3090_v48, 16 }
  0x2b   : > { %v1836_v16 = vsel %vm1835_vm1, %v1834_v12, 0  ;;  %vm1373_vm6 = vcmp.gt.s32.totalorder %v1372_v52, 0  ;;  %v2873_v12 = vmov 0  }
  0x2c   : > { %v1838_v17 = vand.u32 31, %v1836_v16  ;;  %v3058_v25 = vshrl.u32 %v1836_v16, 5  ;;  %v1374_v7 = vsel %vm1373_vm6, %v1372_v52, 0  ;;  %2756 = vset.pattern.permute.xlu0 %v2873_v12  ;;  %2757 = vset.pattern.permute.xlu1 %v2873_v12 }
  0x2d   : > { %2758 = vset.pattern.permute.xlu2 %v2873_v12 }
  0x2e   : > { %v3052_v19 = vsub.s32 32, %v1838_v17  ;;  %v1850_v23 = vshll.u32 %v2867_v22, %v1838_v17  ;;  %v1841_v27 = vshll.u32 %v2868_v26, %v1838_v17  ;;  %v1844_v30 = vshll.u32 %v2869_v28, %v1838_v17 }
  0x2f   : > { %2634 = vmatmul.msk.f32.gmra.mxu0 %vm592_vm0, %v580_v4  ;;  %v1847_v33 = vshll.u32 %v2870_v31, %v1838_v17  ;;  %v1853_v39 = vshll.u32 %v2871_v37, %v1838_v17  ;;  %vm1856_vm2 = vcmp.lt.s32.totalorder %v3058_v25, 1  ;;  %vm1857_vm3 = vcmp.lt.s32.totalorder %v3058_v25, 2 }
  0x30   : > { %v1842_v29 = vshrl.u32 %v2869_v28, %v3052_v19  ;;  %v1845_v32 = vshrl.u32 %v2870_v31, %v3052_v19  ;;  %v1848_v36 = vshrl.u32 %v2867_v22, %v3052_v19  ;;  %v1851_v38 = vshrl.u32 %v2871_v37, %v3052_v19 }
  0x31   : > { %v1854_v43 = vshrl.u32 %v2872_v42, %v3052_v19  ;;  %vm1858_vm4 = vcmp.lt.s32.totalorder %v3058_v25, 3  ;;  %vm1859_vm5 = vcmp.lt.s32.totalorder %v3058_v25, 4  ;;  %v3119_v17 = vshrl.u32 %v1374_v7, 5 }
  0x32   : > { %v3073_v40 = vor.u32 %v1842_v29, %v1841_v27  ;;  %v3075_v41 = vor.u32 %v1845_v32, %v1844_v30  ;;  %v3080_v44 = vor.u32 %v1848_v36, %v1847_v33  ;;  %v1852_v45 = vor.u32 %v1851_v38, %v1850_v23  ;;  %v585_v38 = vld [vmem:[%s3020_s20 + $0x38] sm:$0xff] }
  0x33   : > { %v1855_v46 = vor.u32 %v1854_v43, %v1853_v39  ;;  %v1370_v27 = vor.u32 8388608, %v3115_v1  ;;  %v1376_v29 = vand.u32 31, %v1374_v7  ;;  %vm1394_vm10 = vcmp.lt.s32.totalorder %v3119_v17, 1 }
  0x34   : > { %v1864_v47 = vsel %vm1856_vm2, %v3073_v40, %v3075_v41  ;;  %v1865_v49 = vsel %vm1859_vm5, %v1852_v45, 920167782  ;;  %v1868_v50 = vsel %vm1856_vm2, %v3075_v41, %v3080_v44  ;;  %v1861_v52 = vsel %vm1859_vm5, %v3080_v44, 2102212464 }
  0x35   : > { %v1866_v53 = vsel %vm1858_vm4, %v3080_v44, %v1865_v49  ;;  %v1869_v54 = vsel %vm1859_vm5, %v1855_v46, 1326507024  ;;  %v1840_v46 = vshrl.u32 %v2868_v26, %v3052_v19  ;;  %v1862_v19 = vsel %vm1858_vm4, %v3075_v41, %v1861_v52 }
  0x36   : > { %v1867_v56 = vsel %vm1857_vm3, %v1864_v47, %v1866_v53  ;;  %v1870_v57 = vsel %vm1858_vm4, %v1852_v45, %v1869_v54  ;;  %v1377_v54 = vsub.s32 32, %v1376_v29  ;;  %v1388_v25 = vshll.u32 %v2867_v22, %v1376_v29 }
  0x37   : > { %2635 = vmatmul.msk.f32.gmra.mxu0 %vm592_vm0, %v581_v8  ;;  %v1871_v59 = vsel %vm1857_vm3, %v1868_v50, %v1870_v57  ;;  %v1897_v60 = vand.u32 65535, %v1867_v56  ;;  %v1898_v61 = vshrl.u32 %v1867_v56, 16  ;;  %v1860_v56 = vsel %vm1856_vm2, %v1840_v46, %v3073_v40 }
  0x38   : > { %v1875_v63 = vand.u32 65535, %v1871_v59  ;;  %v1876_v0 = vshrl.u32 %v1871_v59, 16  ;;  %v1863_v44 = vsel %vm1857_vm3, %v1860_v56, %v1862_v19  ;;  %v1383_v40 = vshrl.u32 %v2870_v31, %v1377_v54 }
  0x39   : > { %v1899_v2 = vmul.u32 %v1897_v60, %v1873_v55  ;;  %v1900_v3 = vmul.u32 %v1898_v61, %v1873_v55  ;;  %v1901_v4 = vmul.u32 %v1897_v60, %v1874_v58  ;;  %v1902_v14 = vmul.u32 %v1898_v61, %v1874_v58 }
  0x3a   : > { %v1877_v8 = vmul.u32 %v1875_v63, %v1873_v55  ;;  %v1878_v9 = vmul.u32 %v1876_v0, %v1873_v55  ;;  %v1879_v10 = vmul.u32 %v1875_v63, %v1874_v58  ;;  %v1880_v18 = vmul.u32 %v1876_v0, %v1874_v58 }
  0x3b   : > { %v1905_v16 = vshll.u32 %v1901_v4, 16  ;;  %v1904_v32 = vshrl.u32 %v1900_v3, 16  ;;  %v1906_v43 = vshrl.u32 %v1901_v4, 16  ;;  %v1379_v55 = vshll.u32 %v2868_v26, %v1376_v29 }
  0x3c   : > { %v1881_v20 = vshll.u32 %v1878_v9, 16  ;;  %v1883_v23 = vshll.u32 %v1879_v10, 16  ;;  %v1884_v47 = vshrl.u32 %v1879_v10, 16  ;;  %v1380_v60 = vshrl.u32 %v2869_v28, %v1377_v54 }
  0x3d   : > { %v1382_v61 = vshll.u32 %v2869_v28, %v1376_v29  ;;  %v1917_v63 = vmul.u32 %v3090_v48, %v1863_v44  ;;  %v1385_v0 = vshll.u32 %v2870_v31, %v1376_v29  ;;  %v1389_v7 = vshrl.u32 %v2871_v37, %v1377_v54 }
  0x3e   : > { %vm1885_vm8 = vc.u32 %v1877_v8, %v1881_v20  ;;  %v1887_v30 = vadd.s32 %v1881_v20, %v1877_v8  ;;  %v1381_v41 = vor.u32 %v1380_v60, %v1379_v55  ;;  %v1391_v8 = vshll.u32 %v2871_v37, %v1376_v29 }
  0x3f   : > { %2636 = vmatmul.msk.f32.gmra.mxu0 %vm592_vm0, %v582_v15  ;;  %v1903_v15 = vshll.u32 %v1900_v3, 16  ;;  %v1886_v35 = vsel %vm1885_vm8, 1, %v2873_v12  ;;  %v1384_v4 = vor.u32 %v1383_v40, %v1382_v61  ;;  %vm1397_vm13 = vcmp.lt.s32.totalorder %v3119_v17, 4 }
  0x40   : > { %v1888_v39 = vadd.s32 %v1886_v35, %v1880_v18  ;;  %vm1889_vm11 = vc.u32 %v1887_v30, %v1883_v23  ;;  %vm1396_vm14 = vcmp.lt.s32.totalorder %v3119_v17, 3  ;;  %vm1395_vm15 = vcmp.lt.s32.totalorder %v3119_v17, 2 }
  0x41   : > { %vm1907_vm7 = vc.u32 %v1899_v2, %v1903_v15  ;;  %v1909_v24 = vadd.s32 %v1903_v15, %v1899_v2  ;;  %v1890_v49 = vsel %vm1889_vm11, 1, %v2873_v12  ;;  %v1386_v2 = vshrl.u32 %v2867_v22, %v1377_v54 }
  0x42   : > { %v1908_v33 = vsel %vm1907_vm7, 1, %v2873_v12  ;;  %v1892_v53 = vadd.s32 %v1890_v49, %v1888_v39  ;;  %v1402_v18 = vsel %vm1394_vm10, %v1381_v41, %v1384_v4  ;;  %v1378_v30 = vshrl.u32 %v2868_v26, %v1377_v54 }
  0x43   : > { %v1910_v36 = vadd.s32 %v1908_v33, %v1902_v14  ;;  %vm1911_vm9 = vc.u32 %v1909_v24, %v1905_v16  ;;  %v3143_v57 = vadd.s32 %v1909_v24, %v1905_v16  ;;  %v1387_v48 = vor.u32 %v1386_v2, %v1385_v0 }
  0x44   : > { %v1912_v45 = vsel %vm1911_vm9, 1, %v2873_v12  ;;  %v1390_v14 = vor.u32 %v1389_v7, %v1388_v25  ;;  %v3170_v24 = vshll.u32 %v1370_v27, 8  ;;  %v1398_v60 = vsel %vm1394_vm10, %v1378_v30, %v1381_v41 }
  0x45   : > { %v1914_v50 = vadd.s32 %v1912_v45, %v1910_v36  ;;  %v1406_v23 = vsel %vm1394_vm10, %v1384_v4, %v1387_v48  ;;  %vm1826_vm8 = vcmp.lt.s32.totalorder %v3038_v6, 0  ;;  %vm3242_vm9 = vcmp.le.f32.partialorder %v1824_v21, 0.7853982 }
  0x46   : > { %v1403_v20 = vsel %vm1397_vm13, %v1390_v14, 920167782  ;;  %v1411_v36 = vand.u32 65535, %v3170_v24  ;;  %v1412_v27 = vshrl.u32 %v3170_v24, 16 }
  0x47   : > { %2637 = vmatmul.msk.f32.gmra.mxu0 %vm592_vm0, %v583_v34  ;;  %v1882_v34 = vshrl.u32 %v1878_v9, 16  ;;  %v1915_v58 = vadd.s32 %v1914_v50, %v1904_v32  ;;  %v1392_v9 = vshrl.u32 %v2872_v42, %v1377_v54  ;;  %v1404_v32 = vsel %vm1396_vm14, %v1387_v48, %v1403_v20 }
  0x49   : > { %v1893_v59 = vadd.s32 %v1892_v53, %v1882_v34  ;;  %v1393_v16 = vor.u32 %v1392_v9, %v1391_v8  ;;  %v1405_v34 = vsel %vm1395_vm15, %v1402_v18, %v1404_v32 }
  0x4a   : > { %v1435_v45 = vand.u32 65535, %v1405_v34  ;;  %v1436_v46 = vshrl.u32 %v1405_v34, 16 }
  0x4b   : > { %v3152_v1 = vadd.s32 %v1893_v59, %v1884_v47  ;;  %v1407_v33 = vsel %vm1397_vm13, %v1393_v16, 1326507024  ;;  %v1399_v47 = vsel %vm1397_vm13, %v1387_v48, 2102212464 }
  0x4c   : > { %v1408_v35 = vsel %vm1396_vm14, %v1390_v14, %v1407_v33  ;;  %v1438_v53 = vmul.u32 %v1436_v46, %v1411_v36  ;;  %v1439_v54 = vmul.u32 %v1435_v45, %v1412_v27  ;;  %v1437_v44 = vmul.u32 %v1435_v45, %v1411_v36 }
  0x4d   : > { %vm1919_vm12 = vc.u32 %v3152_v1, %v3143_v57  ;;  %v1400_v61 = vsel %vm1396_vm14, %v1384_v4, %v1399_v47  ;;  %v1440_v2 = vmul.u32 %v1436_v46, %v1412_v27  ;;  %v1918_v45 = vadd.s32 %v3143_v57, %v3152_v1 }
  0x4e   : > { %v1443_v7 = vshll.u32 %v1439_v54, 16  ;;  %v1442_v20 = vshrl.u32 %v1438_v53, 16  ;;  %v1401_v34 = vsel %vm1395_vm15, %v1398_v60, %v1400_v61 }
  0x4f   : > { %2638 = vmatmul.msk.f32.gmra.mxu0 %vm592_vm0, %v584_v62  ;;  %v1916_v62 = vadd.s32 %v1915_v58, %v1906_v43  ;;  %v1409_v43 = vsel %vm1395_vm15, %v1406_v23, %v1408_v35  ;;  %v1444_v35 = vshrl.u32 %v1439_v54, 16  ;;  %v1455_v17 = vmul.u32 %v3170_v24, %v1401_v34 }
  0x50   : > { %v1413_v49 = vand.u32 65535, %v1409_v43  ;;  %v1414_v50 = vshrl.u32 %v1409_v43, 16 }
  0x51   : > { %v1920_v3 = vadd.s32 1, %v1916_v62 }
  0x52   : > { %v1415_v56 = vmul.u32 %v1413_v49, %v1411_v36  ;;  %v1416_v19 = vmul.u32 %v1414_v50, %v1411_v36  ;;  %v1417_v58 = vmul.u32 %v1413_v49, %v1412_v27 }
  0x53   : > { %v1921_v10 = vsel %vm1919_vm12, %v1920_v3, %v1916_v62  ;;  %v1441_v62 = vshll.u32 %v1438_v53, 16 }
  0x54   : > { %v1922_v15 = vadd.s32 %v1921_v10, %v1917_v63  ;;  %v1418_v63 = vmul.u32 %v1414_v50, %v1412_v27  ;;  %v1419_v40 = vshll.u32 %v1416_v19, 16  ;;  %v1421_v0 = vshll.u32 %v1417_v58, 16 }
  0x55   : > { %v1420_v3 = vshrl.u32 %v1416_v19, 16  ;;  %vm1445_vm2 = vc.u32 %v1437_v44, %v1441_v62  ;;  %v1447_v48 = vadd.s32 %v1441_v62, %v1437_v44  ;;  %v1422_v30 = vshrl.u32 %v1417_v58, 16 }
  0x56   : > { %v1923_v29 = vadd.s32 536870912, %v1922_v15  ;;  %vm1423_vm1 = vc.u32 %v1415_v56, %v1419_v40  ;;  %v1425_v8 = vadd.s32 %v1419_v40, %v1415_v56  ;;  %v1446_v41 = vsel %vm1445_vm2, 1, %v2873_v12 }
  0x57   : > { %2639 = vmatmul.msk.f32.gmra.mxu0 %vm592_vm0, %v585_v38  ;;  %v884_v38 = vld [vmem:[%s3031_s26] sm:$0xff]  ;;  %v1424_v10 = vsel %vm1423_vm1, 1, %v2873_v12  ;;  %v1448_v16 = vadd.s32 %v1446_v41, %v1440_v2  ;;  %vm1449_vm4 = vc.u32 %v1447_v48, %v1443_v7  ;;  %v3204_v43 = vadd.s32 %v1447_v48, %v1443_v7 }
  0x58   : > { %v3184_v39 = vshrl.u32 %v1923_v29, 30  ;;  %v3191_v55 = vmul.f32 0.62831855, %v884_v38  ;;  %vm1427_vm3 = vc.u32 %v1425_v8, %v1421_v0  ;;  %v1450_v33 = vsel %vm1449_vm4, 1, %v2873_v12 }
  0x59   : > { %v1428_v18 = vsel %vm1427_vm3, 1, %v2873_v12  ;;  %v1452_v36 = vadd.s32 %v1450_v33, %v1448_v16  ;;  %vm1967_vm3 = vweird.f32 %v3038_v6 }
  0x5a   : > { %v1925_v52 = vshll.u32 %v3184_v39, 30  ;;  %v903_v4 = vand.u32 2139095040, %v3191_v55  ;;  %v900_v19 = vand.u32 2147483647, %v3191_v55 }
  0x5b   : > { %v1453_v47 = vadd.s32 %v1452_v36, %v1442_v20 }
  0x5c   : > { %v1926_v59 = vsub.s32 %v1922_v15, %v1925_v52  ;;  %v1426_v15 = vadd.s32 %v1424_v10, %v1418_v63  ;;  %v904_v23 = vshrl.u32 %v903_v4, 23  ;;  %v907_v2 = vand.u32 8388607, %v900_v19 }
  0x5d   : > { %v1454_v54 = vadd.s32 %v1453_v47, %v1444_v35 }
  0x5e   : > { %vm1927_vm0 = vcmp.lt.s32.totalorder %v1926_v59, 0  ;;  %v1928_v25 = vsub.s32 0, %v1926_v59  ;;  %v1430_v32 = vadd.s32 %v1428_v18, %v1426_v15  ;;  %v2656_v27 = vadd.s32 4294967169, %v904_v23 }
  0x5f   : > { %v1458_v1 = vadd.s32 1, %v1454_v54  ;;  %v908_v23 = vor.u32 8388608, %v907_v2 }
  0x60   : > { %v1929_v9 = vsel %vm1927_vm0, %v1928_v25, %v1926_v59  ;;  %v1431_v38 = vadd.s32 %v1430_v32, %v1420_v3  ;;  %v910_v49 = vadd.s32 1, %v2656_v27 }
  0x61   : > { %v1930_v14 = vclz %v1929_v9 }
  0x62   : > { %v3208_v53 = vadd.s32 %v1431_v38, %v1422_v30  ;;  %vm911_vm6 = vcmp.gt.s32.totalorder %v910_v49, 0 }
  0x63   : > { %v2675_v29 = vadd.s32 4294967294, %v1930_v14  ;;  %v912_v57 = vsel %vm911_vm6, %v910_v49, 0  ;;  %v3269_v49 = vshll.u32 %v908_v23, 8  ;;  %vm2154_vm6 = vcmp.lt.f32.partialorder %v3035_v5, 5.0 }
  0x64   : > { %vm1457_vm7 = vc.u32 %v3208_v53, %v3204_v43  ;;  %v914_v60 = vand.u32 31, %v912_v57  ;;  %v3218_v25 = vshrl.u32 %v912_v57, 5 }
  0x65   : > { %vm2676_vm5 = vcmp.lt.s32.totalorder %v2675_v29, 0  ;;  %v1459_v63 = vsel %vm1457_vm7, %v1458_v1, %v1454_v54  ;;  %vm1364_vm7 = vcmp.lt.s32.totalorder %v3047_v13, 0 }
  0x66   : > { %v1933_v46 = vsel %vm2676_vm5, 0, %v2675_v29  ;;  %v3214_v40 = vsub.s32 32, %v914_v60  ;;  %v917_v3 = vshll.u32 %v2868_v26, %v914_v60  ;;  %v920_v8 = vshll.u32 %v2869_v28, %v914_v60 }
  0x67   : > { %v1934_v50 = vsub.s32 32, %v1933_v46  ;;  %v1938_v52 = vsub.s32 4294967266, %v1933_v46  ;;  %v1935_v56 = vshll.u32 %v1926_v59, %v1933_v46  ;;  %v1460_v59 = vadd.s32 %v1459_v63, %v1455_v17 }
  0x68   : > { %v918_v7 = vshrl.u32 %v2869_v28, %v3214_v40  ;;  %v921_v10 = vshrl.u32 %v2870_v31, %v3214_v40  ;;  %v926_v41 = vshll.u32 %v2867_v22, %v914_v60  ;;  %v923_v4 = vshll.u32 %v2870_v31, %v914_v60 }
  0x69   : > { %v1936_v58 = vshrl.u32 %v1918_v45, %v1934_v50  ;;  %v1939_v44 = vadd.s32 127, %v1938_v52  ;;  %v1461_v9 = vadd.s32 536870912, %v1460_v59  ;;  %v924_v14 = vshrl.u32 %v2867_v22, %v3214_v40  ;;  %v2256_v50 = vld [vmem:[%s3253_s16] sm:$0xff] }
  0x6a   : > { %v927_v15 = vshrl.u32 %v2871_v37, %v3214_v40  ;;  %v929_v16 = vshll.u32 %v2871_v37, %v914_v60  ;;  %v3236_v29 = vor.u32 %v918_v7, %v917_v3  ;;  %v930_v32 = vshrl.u32 %v2872_v42, %v3214_v40  ;;  %2267 = vperm.xlu0 %2756, %v2256_v50   ;;  %v889_v3 = vld [vmem:[%s3031_s26 + $0x28] sm:$0xff] }
  0x6b   : > { %v1937_v61 = vor.u32 %v1936_v58, %v1935_v56  ;;  %v1940_v62 = vshll.u32 %v1939_v44, 23  ;;  %v3233_v20 = vshrl.u32 %v1461_v9, 30  ;;  %v3247_v36 = vor.u32 %v921_v10, %v920_v8 }
  0x6c   : > { %v928_v30 = vor.u32 %v927_v15, %v926_v41  ;;  %v3255_v27 = vor.u32 %v924_v14, %v923_v4  ;;  %v931_v38 = vor.u32 %v930_v32, %v929_v16  ;;  %vm932_vm10 = vcmp.lt.s32.totalorder %v3218_v25, 1  ;;  %v2257_v16 = vld [vmem:[%s3253_s16 + $0x8] sm:$0xff] }
  0x6d   : > { %v1941_v0 = vor.u32 4788187, %v1940_v62  ;;  %v1944_v24 = vcvt.s32.f32 %v1937_v61  ;;  %v1463_v35 = vshll.u32 %v3233_v20, 30  ;;  %vm935_vm11 = vcmp.lt.s32.totalorder %v3218_v25, 4 }
  0x6e   : > { %vm934_vm12 = vcmp.lt.s32.totalorder %v3218_v25, 3  ;;  %v941_v46 = vsel %vm935_vm11, %v928_v30, 920167782  ;;  %vm933_vm14 = vcmp.lt.s32.totalorder %v3218_v25, 2  ;;  %v940_v56 = vsel %vm932_vm10, %v3236_v29, %v3247_v36 }
  0x6f   : > { %v1942_v48 = vand.u32 2147483647, %v1941_v0  ;;  %v3261_v45 = vsub.s32 %v1460_v59, %v1463_v35  ;;  %v942_v54 = vsel %vm934_vm12, %v3255_v27, %v941_v46  ;;  %v944_v58 = vsel %vm932_vm10, %v3247_v36, %v3255_v27 }
  0x70   : > { %v945_v44 = vsel %vm935_vm11, %v931_v38, 1326507024  ;;  %v3292_v63 = vand.u32 65535, %v3269_v49  ;;  %v3296_v59 = vsel %vm933_vm14, %v940_v56, %v942_v54  ;;  %v3302_v8 = vshrl.u32 %v3269_v49, 16 }
  0x71   : > { %v1945_v18 = vmul.f32 %v1944_v24, %v1942_v48  ;;  %vm1465_vm13 = vcmp.lt.s32.totalorder %v3261_v45, 0  ;;  %v1466_v17 = vsub.s32 0, %v3261_v45  ;;  %v946_v62 = vsel %vm934_vm12, %v928_v30, %v945_v44 }
  0x72   : > { %v947_v2 = vsel %vm933_vm14, %v944_v58, %v946_v62  ;;  %v974_v14 = vshrl.u32 %v3296_v59, 16  ;;  %v3308_v15 = vmul.f32 0.62831855, %v889_v3  ;;  %v1456_v32 = vadd.s32 %v3204_v43, %v3208_v53  ;;  %2270 = vperm.xlu0 %2756, %v2257_v16   ;;  %v2262_v3 = vld [vmem:[%s3253_s16 + $0x30] sm:$0xff] }
  0x73   : > { %v1946_v34 = vxor.u32 2147483648, %v1945_v18  ;;  %v1467_v60 = vsel %vm1465_vm13, %v1466_v17, %v3261_v45  ;;  %v951_v48 = vand.u32 65535, %v947_v2  ;;  %v952_v9 = vshrl.u32 %v947_v2, 16 }
  0x74   : > { %v1468_v61 = vclz %v1467_v60  ;;  %v973_v58 = vand.u32 65535, %v3296_v59  ;;  %v3382_v59 = vld [vmem:[%s4309_s7] ss:$0 sm:$0xff]  ;;  %vm1505_vm13 = vweird.f32 %v3047_v13 }
  0x75   : > { %v1947_v21 = vsel %vm1826_vm8, %v1946_v34, %v1945_v18  ;;  %v3305_v4 = vmul.u32 %v952_v9, %v3292_v63  ;;  %v1948_v18 = vsub.s32 4, %v3184_v39  ;;  %v953_v35 = vmul.u32 %v951_v48, %v3292_v63 }
  0x76   : > { %v1950_v47 = vsel %vm3242_vm9, %v3038_v6, %v1947_v21  ;;  %v2666_v7 = vadd.s32 4294967294, %v1468_v61  ;;  %v3316_v38 = vmul.u32 %v951_v48, %v3302_v8  ;;  %v956_v62 = vmul.u32 %v952_v9, %v3302_v8  ;;  %v812_v6 = vld [vmem:[%s4310_s8 + $0x10] sm:$0xff] }
  0x77   : > { %v1952_v52 = vmul.f32 %v1950_v47, %v1950_v47  ;;  %v957_v21 = vshll.u32 %v3305_v4, 16  ;;  %v1949_v46 = vsel %vm1826_vm8, %v1948_v18, %v3184_v39  ;;  %v3330_v39 = vmul.u32 %v974_v14, %v3292_v63 }
  0x78   : > { %vm2667_vm15 = vcmp.lt.s32.totalorder %v2666_v7, 0  ;;  %v1951_v54 = vsel %vm3242_vm9, 0, %v1949_v46  ;;  %v916_v18 = vshrl.u32 %v2868_v26, %v3214_v40  ;;  %v937_v46 = vsel %vm935_vm11, %v3255_v27, 2102212464 }
  0x79   : > { %v1953_v57 = vmul.f32 -0.001358992, %v1952_v52  ;;  %v1960_v1 = vmul.f32 -0.00019511016, %v1952_v52  ;;  %v1471_v34 = vsel %vm2667_vm15, 0, %v2666_v7  ;;  %vm961_vm0 = vc.u32 %v953_v35, %v957_v21 }
  0x7a   : > { %v1472_v56 = vsub.s32 32, %v1471_v34  ;;  %v1473_v43 = vshll.u32 %v3261_v45, %v1471_v34  ;;  %v1476_v53 = vsub.s32 4294967266, %v1471_v34  ;;  %v962_v2 = vsel %vm961_vm0, 1, %v2873_v12  ;;  %2285 = vperm.xlu0 %2756, %v2262_v3  }
  0x7b   : > { %v1954_v0 = vadd.f32 0.041655596, %v1953_v57  ;;  %v1961_v24 = vadd.f32 0.008332121, %v1960_v1  ;;  %v1968_v1 = vand.u32 3, %v1951_v54  ;;  %v979_v27 = vshll.u32 %v3330_v39, 16 }
  0x7c   : > { %v1474_v60 = vshrl.u32 %v1456_v32, %v1472_v56  ;;  %v1477_v61 = vadd.s32 127, %v1476_v53  ;;  %v958_v54 = vshrl.u32 %v3305_v4, 16  ;;  %v2170_v4 = vld [vmem:[%s3352_s1 + $0x30] sm:$0xff]  ;;  %vm3372_vm8 = vcmp.le.f32.partialorder %v1362_v51, 0.7853982 }
  0x7d   : > { %v1955_v10 = vmul.f32 %v1954_v0, %v1952_v52  ;;  %v1962_v41 = vmul.f32 %v1961_v24, %v1952_v52  ;;  %vm1973_vm1 = vcmp.eq.s32.totalorder %v1968_v1, 2  ;;  %vm1970_vm2 = vcmp.eq.s32.totalorder %v1968_v1, 0 }
  0x7e   : > { %v1475_v0 = vor.u32 %v1474_v60, %v1473_v43  ;;  %v1478_v24 = vshll.u32 %v1477_v61, 23  ;;  %vm1969_vm4 = vcmp.lt.s32.totalorder %v1968_v1, 2  ;;  %v936_v1 = vsel %vm932_vm10, %v916_v18, %v3236_v29 }
  0x7f   : > { %v1956_v23 = vadd.f32 -0.4999988, %v1955_v10  ;;  %v1963_v30 = vadd.f32 -0.16666654, %v1962_v41  ;;  %v964_v41 = vadd.s32 %v962_v2, %v956_v62  ;;  %v960_v51 = vshrl.u32 %v3316_v38, 16 }
  0x80   : > { %v1479_v9 = vor.u32 4788187, %v1478_v24  ;;  %v1482_v10 = vcvt.s32.f32 %v1475_v0  ;;  %v980_v60 = vshrl.u32 %v3330_v39, 16  ;;  %v1486_v24 = vsub.s32 4, %v3233_v20 }
  0x81   : > { %v1957_v50 = vmul.f32 %v1956_v23, %v1952_v52  ;;  %v1964_v17 = vmul.f32 %v1963_v30, %v1952_v52  ;;  %v959_v52 = vshll.u32 %v3316_v38, 16  ;;  %v3339_v23 = vmul.u32 %v973_v58, %v3302_v8  ;;  %v810_v38 = vld [vmem:[%s4310_s8] sm:$0xff] }
  0x82   : > { %v1673_v30 = vand.u32 2139095040, %v3308_v15  ;;  %v1480_v34 = vand.u32 2147483647, %v1479_v9  ;;  %v938_v3 = vsel %vm934_vm12, %v3247_v36, %v937_v46  ;;  %v1487_v46 = vsel %vm1364_vm7, %v1486_v24, %v3233_v20 }
  0x83   : > { %v1958_v44 = vadd.f32 1.0, %v1957_v50  ;;  %v1965_v57 = vadd.f32 1.0, %v1964_v17  ;;  %v975_v50 = vmul.u32 %v973_v58, %v3292_v63  ;;  %v978_v63 = vmul.u32 %v974_v14, %v3302_v8  ;;  %v811_v8 = vld [vmem:[%s4310_s8 + $0x8] sm:$0xff]  ;;  %v2258_v14 = vld [vmem:[%s3253_s16 + $0x10] sm:$0xff] }
  0x84   : > { %v1483_v56 = vmul.f32 %v1482_v10, %v1480_v34  ;;  %v981_v53 = vshll.u32 %v3339_v23, 16  ;;  %2273 = vperm.xlu1 %2757, %v2258_v14   ;;  %v982_v9 = vshrl.u32 %v3339_v23, 16  ;;  %v939_v36 = vsel %vm933_vm14, %v936_v1, %v938_v3 }
  0x85   : > { %v1966_v33 = vmul.f32 %v1965_v57, %v1950_v47  ;;  %v1974_v45 = vxor.u32 2147483648, %v1958_v44  ;;  %v963_v47 = vadd.s32 %v957_v21, %v953_v35  ;;  %v813_v35 = vld [vmem:[%s4310_s8 + $0x18] sm:$0xff]  ;;  %vm983_vm9 = vc.u32 %v975_v50, %v979_v27 }
  0x86   : > { %855 = vmatpush.msra.mxu1 %v813_v35  ;;  %2705 = vmatpush.msra.mxu2 %v813_v35  ;;  %v1484_v57 = vxor.u32 2147483648, %v1483_v56  ;;  %v985_v61 = vadd.s32 %v979_v27, %v975_v50  ;;  %v2259_v50 = vld [vmem:[%s3253_s16 + $0x18] sm:$0xff]  ;;  %v1489_v20 = vsel %vm3372_vm8, 0, %v1487_v46 }
  0x87   : > { %v1971_v7 = vxor.u32 2147483648, %v1966_v33  ;;  %v1975_v48 = vsel %vm1973_vm1, %v1974_v45, %v1966_v33  ;;  %vm965_vm5 = vc.u32 %v963_v47, %v959_v52  ;;  %v984_v45 = vsel %vm983_vm9, 1, %v2873_v12 }
  0x88   : > { %v966_v21 = vsel %vm965_vm5, 1, %v2873_v12  ;;  %856 = vmatpush.msra.mxu1 %v812_v6  ;;  %2706 = vmatpush.msra.mxu2 %v812_v6  ;;  %v1485_v62 = vsel %vm1364_vm7, %v1484_v57, %v1483_v56  ;;  %v986_v0 = vadd.s32 %v984_v45, %v978_v63  ;;  %vm987_vm10 = vc.u32 %v985_v61, %v981_v53 }
  0x89   : > { %v1972_v16 = vsel %vm1970_vm2, %v1958_v44, %v1971_v7  ;;  %v968_v43 = vadd.s32 %v966_v21, %v964_v41  ;;  %v1488_v39 = vsel %vm3372_vm8, %v3047_v13, %v1485_v62  ;;  %v988_v7 = vsel %vm987_vm10, 1, %v2873_v12  ;;  %v2260_v62 = vld [vmem:[%s3253_s16 + $0x20] sm:$0xff] }
  0x8a   : > { %v1976_v32 = vsel %vm1969_vm4, %v1972_v16, %v1975_v48  ;;  %857 = vmatpush.msra.mxu1 %v811_v8  ;;  %2707 = vmatpush.msra.mxu2 %v811_v8  ;;  %v1490_v2 = vmul.f32 %v1488_v39, %v1488_v39  ;;  %v990_v10 = vadd.s32 %v988_v7, %v986_v0  ;;  %v1506_v1 = vand.u32 3, %v1489_v20 }
  0x8b   : > { %v1977_v40 = vsel %vm1967_vm3, nan, %v1976_v32  ;;  %v969_v33 = vadd.s32 %v968_v43, %v958_v54  ;;  %v3412_v18 = vadd.s32 %v985_v61, %v981_v53  ;;  %v993_v54 = vmul.u32 %v3269_v49, %v939_v36  ;;  %2279 = vperm.xlu2 %2758, %v2260_v62  }
  0x8c   : > { %v2138_v17 = vadd.f32 1.0, %v1977_v40  ;;  %858 = vmatpush.msra.mxu1 %v810_v38  ;;  %2708 = vmatpush.msra.mxu2 %v810_v38  ;;  %v1491_v47 = vmul.f32 -0.001358992, %v1490_v2  ;;  %v1498_v41 = vmul.f32 -0.00019511016, %v1490_v2  ;;  %v991_v34 = vadd.s32 %v990_v10, %v980_v60 }
  0x8d   : > { %v3410_v16 = vadd.s32 %v969_v33, %v960_v51  ;;  %v1674_v40 = vshrl.u32 %v1673_v30, 23  ;;  %2276 = vperm.xlu1 %2757, %v2259_v50   ;;  %v2263_v33 = vld [vmem:[%s3253_s16 + $0x38] sm:$0xff]  ;;  %vm1511_vm12 = vcmp.eq.s32.totalorder %v1506_v1, 2  ;;  %vm1507_vm14 = vcmp.lt.s32.totalorder %v1506_v1, 2 }
  0x8e   : > { %v2146_v58 = vmul.f32 0.5, %v2138_v17  ;;  %v1492_v35 = vadd.f32 0.041655596, %v1491_v47  ;;  %v1499_v23 = vadd.f32 0.008332121, %v1498_v41  ;;  %v992_v27 = vadd.s32 %v991_v34, %v982_v9 }
  0x8f   : > { %vm995_vm11 = vc.u32 %v3410_v16, %v3412_v18  ;;  %v2671_v53 = vadd.s32 4294967169, %v1674_v40  ;;  %vm1508_vm15 = vcmp.eq.s32.totalorder %v1506_v1, 0  ;;  %vm818_vm2 = vcmask 261120  }
  0x90   : > { %v2162_v29 = vsel %vm2154_vm6, %v2146_v58, 0.0  ;;  %v1493_v17 = vmul.f32 %v1492_v35, %v1490_v2  ;;  %v1500_v56 = vmul.f32 %v1499_v23, %v1490_v2  ;;  %v996_v43 = vadd.s32 1, %v992_v27 }
  0x91   : > { %v2178_v52 = vmul.f32 %v2170_v4, %v2162_v29  ;;  %v1680_v61 = vadd.s32 1, %v2671_v53  ;;  %v1670_v35 = vand.u32 2147483647, %v3308_v15  ;;  %vm2151_vm3 = vcmp.lt.f32.partialorder %v3044_v11, 5.0 }
  0x92   : > { %v1494_v63 = vadd.f32 -0.4999988, %v1493_v17  ;;  %v1501_v30 = vadd.f32 -0.16666654, %v1500_v56  ;;  %v997_v4 = vsel %vm995_vm11, %v996_v43, %v992_v27  ;;  %vm902_vm9 = vcmp.lt.s32.totalorder %v3191_v55, 0 }
  0x93   : > { %2212 = vperm.xlu0 %2756, %v2178_v52   ;;  %v998_v8 = vadd.s32 %v997_v4, %v993_v54  ;;  %vm1681_vm0 = vcmp.gt.s32.totalorder %v1680_v61, 0  ;;  %v3455_v53 = vand.u32 8388607, %v1670_v35 }
  0x94   : > { %v1495_v49 = vmul.f32 %v1494_v63, %v1490_v2  ;;  %v1502_v57 = vmul.f32 %v1501_v30, %v1490_v2  ;;  %v1682_v23 = vsel %vm1681_vm0, %v1680_v61, 0 }
  0x95   : > { %v999_v60 = vadd.s32 536870912, %v998_v8  ;;  %2288 = vperm.xlu1 %2757, %v2263_v33   ;;  %v1684_v20 = vand.u32 31, %v1682_v23  ;;  %v1678_v61 = vor.u32 8388608, %v3455_v53 }
  0x96   : > { %v1496_v44 = vadd.f32 1.0, %v1495_v49  ;;  %v1503_v51 = vadd.f32 1.0, %v1502_v57 }
  0x97   : > { %v3434_v38 = vshrl.u32 %v999_v60, 30 }
  0x98   : > { %v1504_v45 = vmul.f32 %v1503_v51, %v1488_v39  ;;  %v1512_v52 = vxor.u32 2147483648, %v1496_v44  ;;  %v3460_v51 = vsub.s32 32, %v1684_v20 }
  0x99   : > { %v1001_v10 = vshll.u32 %v3434_v38, 30 }
  0x9a   : > { %v1509_v7 = vxor.u32 2147483648, %v1504_v45  ;;  %v1513_v9 = vsel %vm1511_vm12, %v1512_v52, %v1504_v45  ;;  %v1687_v45 = vshll.u32 %v2868_v26, %v1684_v20 }
  0x9b   : > { %v3443_v36 = vsub.s32 %v998_v8, %v1001_v10 }
  0x9c   : > { %v634_v5 = vpop.f32.mrf.mxu0  ;;  %v1510_v47 = vsel %vm1508_vm15, %v1496_v44, %v1509_v7 }
  0x9d   : > { %v3407_v48 = vadd.f32 %v3382_v59, %v634_v5  ;;  %vm1003_vm1 = vcmp.lt.s32.totalorder %v3443_v36, 0  ;;  %v1004_v50 = vsub.s32 0, %v3443_v36 }
  0x9f   : > { %v682_v32 = vand.u32 2147483647, %v3407_v48  ;;  %v1005_v13 = vsel %vm1003_vm1, %v1004_v50, %v3443_v36  ;;  %v658_v11 = vmax.f32 %v3407_v48, 0.0  ;;  %vm666_vm5 = vcmp.ne.f32.partialorder %v3407_v48, %v3407_v48 }
  0xa0   : > { %v1006_v30 = vclz %v1005_v13  ;;  %v1691_v50 = vshrl.u32 %v2870_v31, %v3460_v51 }
  0xa1   : > { %v690_v21 = vsub.f32 0.0, %v682_v32  ;;  %v1514_v32 = vsel %vm1507_vm14, %v1510_v47, %v1513_v9  ;;  %v1690_v47 = vshll.u32 %v2869_v28, %v1684_v20  ;;  %vm3512_vm14 = vcmp.le.f32.partialorder %v900_v19, 0.7853982 }
  0xa2   : > { %v1515_v46 = vsel %vm1505_vm13, nan, %v1514_v32  ;;  %v2657_v44 = vadd.s32 4294967294, %v1006_v30 }
  0xa3   : > { %v698_v25 = vmul.f32 1.442695, %v690_v21  ;;  %v2135_v21 = vadd.f32 1.0, %v1515_v46 }
  0xa4   : > { %v637_v6 = vpop.f32.mrf.mxu0  ;;  %vm2658_vm6 = vcmp.lt.s32.totalorder %v2657_v44, 0 }
  0xa5   : > { %2763 = vpow2.f32 %v698_v25  ;;  %v3429_v58 = vadd.f32 %v3382_v59, %v637_v6  ;;  %v2143_v54 = vmul.f32 0.5, %v2135_v21  ;;  %v2167_v25 = vld [vmem:[%s3352_s1 + $0x18] sm:$0xff] }
  0xa7   : > { %v683_v14 = vand.u32 2147483647, %v3429_v58  ;;  %v2159_v49 = vsel %vm2151_vm3, %v2143_v54, 0.0  ;;  %v659_v52 = vmax.f32 %v3429_v58, 0.0  ;;  %vm667_vm7 = vcmp.ne.f32.partialorder %v3429_v58, %v3429_v58 }
  0xa8   : > { %v2175_v1 = vmul.f32 %v2167_v25, %v2159_v49  ;;  %v1694_v25 = vshrl.u32 %v2867_v22, %v3460_v51 }
  0xa9   : > { %v691_v29 = vsub.f32 0.0, %v683_v14  ;;  %v994_v14 = vadd.s32 %v3412_v18, %v3410_v16  ;;  %v1009_v18 = vsel %vm2658_vm6, 0, %v2657_v44 }
  0xaa   : > { %2197 = vperm.xlu0 %2756, %v2175_v1   ;;  %v1014_v9 = vsub.s32 4294967266, %v1009_v18 }
  0xab   : > { %v2764_v0 = vpop.eup %2763  ;;  %v700_v5 = vmul.f32 1.442695, %v691_v29  ;;  %v3465_v29 = vshrl.u32 %v1682_v23, 5  ;;  %v1697_v23 = vshrl.u32 %v2871_v37, %v3460_v51 }
  0xac   : > { %v640_v24 = vpop.f32.mrf.mxu0  ;;  %v714_v2 = vadd.f32 1.0, %v2764_v0  ;;  %v717_v3 = vmul.f32 -0.5, %v2764_v0  ;;  %v720_v27 = vand.u32 2147483647, %v2764_v0  ;;  %v1015_v46 = vadd.s32 127, %v1014_v9 }
  0xad   : > { %2765 = vpow2.f32 %v700_v5  ;;  %v3438_v39 = vadd.f32 %v3382_v59, %v640_v24  ;;  %v1010_v24 = vsub.s32 32, %v1009_v18  ;;  %vm1702_vm10 = vcmp.lt.s32.totalorder %v3465_v29, 1 }
  0xae   : > { %2767 = vlog2.f32 %v714_v2  ;;  %v718_v34 = vadd.f32 1.0, %v717_v3  ;;  %vm721_vm4 = vcmp.lt.f32.partialorder %v720_v27, 0.0004427343  ;;  %v1011_v2 = vshll.u32 %v3443_v36, %v1009_v18 }
  0xaf   : > { %v684_v41 = vand.u32 2147483647, %v3438_v39  ;;  %v1688_v3 = vshrl.u32 %v2869_v28, %v3460_v51  ;;  %v1693_v27 = vshll.u32 %v2870_v31, %v1684_v20  ;;  %v1016_v54 = vshll.u32 %v1015_v46, 23 }
  0xb0   : > { %v719_v6 = vmul.f32 %v2764_v0, %v718_v34  ;;  %v1012_v34 = vshrl.u32 %v994_v14, %v1010_v24  ;;  %v3497_v14 = vor.u32 %v1691_v50, %v1690_v47  ;;  %vm1705_vm11 = vcmp.lt.s32.totalorder %v3465_v29, 4 }
  0xb1   : > { %v692_v40 = vsub.f32 0.0, %v684_v41  ;;  %v1696_v41 = vshll.u32 %v2867_v22, %v1684_v20  ;;  %vm1704_vm12 = vcmp.lt.s32.totalorder %v3465_v29, 3  ;;  %vm1703_vm15 = vcmp.lt.s32.totalorder %v3465_v29, 2 }
  0xb2   : > { %v1013_v21 = vor.u32 %v1012_v34, %v1011_v2  ;;  %vm668_vm0 = vcmp.ne.f32.partialorder %v3438_v39, %v3438_v39  ;;  %v3537_v47 = vshll.u32 %v1678_v61, 8 }
  0xb3   : > { %v2766_v17 = vpop.eup %2765  ;;  %v702_v56 = vmul.f32 1.442695, %v692_v40 }
  0xb4   : > { %v2768_v43 = vpop.eup %2767  ;;  %v723_v63 = vadd.f32 1.0, %v2766_v17  ;;  %v726_v57 = vmul.f32 -0.5, %v2766_v17  ;;  %v729_v33 = vand.u32 2147483647, %v2766_v17  ;;  %v1020_v49 = vcvt.s32.f32 %v1013_v21  ;;  %v643_v18 = vpop.f32.mrf.mxu0  ;;  %v3557_v21 = vld [vmem:[%s3031_s26 + $0x38] sm:$0xff] }
  0xb5   : > { %2769 = vpow2.f32 %v702_v56  ;;  %v716_v4 = vmul.f32 0.6931472, %v2768_v43 }
  0xb6   : > { %2771 = vlog2.f32 %v723_v63  ;;  %v727_v62 = vadd.f32 1.0, %v726_v57  ;;  %vm730_vm8 = vcmp.lt.f32.partialorder %v729_v33, 0.0004427343  ;;  %v1700_v63 = vshrl.u32 %v2872_v42, %v3460_v51 }
  0xb7   : > { %v722_v8 = vsel %vm721_vm4, %v719_v6, %v716_v4  ;;  %v1699_v6 = vshll.u32 %v2871_v37, %v1684_v20  ;;  %v1017_v4 = vor.u32 4788187, %v1016_v54  ;;  %v1698_v57 = vor.u32 %v1697_v23, %v1696_v41 }
  0xb8   : > { %v786_v60 = vadd.f32 %v722_v8, %v658_v11  ;;  %v728_v32 = vmul.f32 %v2766_v17, %v727_v62  ;;  %v1024_v17 = vsub.s32 4, %v3434_v38  ;;  %v660_v11 = vmax.f32 %v3438_v39, 0.0 }
  0xb9   : > { %v3495_v8 = vor.u32 %v1688_v3, %v1687_v45  ;;  %v1018_v20 = vand.u32 2147483647, %v1017_v4  ;;  %v1701_v33 = vor.u32 %v1700_v63, %v1699_v6  ;;  %v2261_v3 = vld [vmem:[%s3253_s16 + $0x28] sm:$0xff]  ;;  %v3540_v41 = vadd.f32 %v3382_v59, %v643_v18 }
  0xba   : > { %v794_v16 = vsel %vm666_vm5, %v3407_v48, %v786_v60  ;;  %v3499_v60 = vor.u32 %v1694_v25, %v1693_v27  ;;  %2282 = vperm.xlu2 %2758, %v2261_v3   ;;  %v1719_v23 = vand.u32 65535, %v3537_v47 }
  0xbb   : > { %v2770_v0 = vpop.eup %2769  ;;  %v2640_v5 = vadd.f32 -0.6931472, %v794_v16  ;;  %v1021_v45 = vmul.f32 %v1020_v49, %v1018_v20  ;;  %v1711_v16 = vsel %vm1705_vm11, %v1698_v57, 920167782  ;;  %v1710_v24 = vsel %vm1702_vm10, %v3495_v8, %v3497_v14 }
  0xbc   : > { %v2772_v7 = vpop.eup %2771  ;;  %v732_v10 = vadd.f32 1.0, %v2770_v0  ;;  %v735_v36 = vmul.f32 -0.5, %v2770_v0  ;;  %v738_v43 = vand.u32 2147483647, %v2770_v0  ;;  %v1714_v19 = vsel %vm1702_vm10, %v3497_v14, %v3499_v60 }
  0xbd   : > { %2648 = vmatmul.msk.f32.vlgmr.msra.gmra.mxu1 %vm818_vm2, %v2640_v5  ;;  %v725_v48 = vmul.f32 0.6931472, %v2772_v7  ;;  %v1712_v7 = vsel %vm1704_vm12, %v3499_v60, %v1711_v16  ;;  %v685_v4 = vand.u32 2147483647, %v3540_v41 }
  0xbe   : > { %2773 = vlog2.f32 %v732_v10  ;;  %v736_v13 = vadd.f32 1.0, %v735_v36  ;;  %vm739_vm13 = vcmp.lt.f32.partialorder %v738_v43, 0.0004427343  ;;  %v1715_v10 = vsel %vm1705_vm11, %v1701_v33, 1326507024 }
  0xbf   : > { %v731_v40 = vsel %vm730_vm8, %v728_v32, %v725_v48  ;;  %v1716_v34 = vsel %vm1704_vm12, %v1698_v57, %v1715_v10  ;;  %v1713_v53 = vsel %vm1703_vm15, %v1710_v24, %v1712_v7  ;;  %v1686_v43 = vshrl.u32 %v2868_v26, %v3460_v51 }
  0xc0   : > { %v787_v56 = vadd.f32 %v731_v40, %v659_v52  ;;  %v737_v62 = vmul.f32 %v2770_v0, %v736_v13  ;;  %v1025_v52 = vsel %vm902_vm9, %v1024_v17, %v3434_v38  ;;  %v1022_v38 = vxor.u32 2147483648, %v1021_v45 }
  0xc1   : > { %v1027_v9 = vsel %vm3512_vm14, 0, %v1025_v52  ;;  %v1717_v59 = vsel %vm1703_vm15, %v1714_v19, %v1716_v34  ;;  %v1720_v40 = vshrl.u32 %v3537_v47, 16  ;;  %v1744_v13 = vshrl.u32 %v1713_v53, 16 }
  0xc2   : > { %v795_v30 = vsel %vm667_vm7, %v3429_v58, %v787_v56  ;;  %v1023_v48 = vsel %vm902_vm9, %v1022_v38, %v1021_v45  ;;  %v3559_v50 = vand.u32 3, %v1027_v9  ;;  %v1722_v27 = vshrl.u32 %v1717_v59, 16 }
  0xc3   : > { %v2641_v1 = vadd.f32 -0.6931472, %v795_v30  ;;  %v1026_v46 = vsel %vm3512_vm14, %v3191_v55, %v1023_v48  ;;  %v1743_v56 = vand.u32 65535, %v1713_v53  ;;  %v3565_v30 = vmul.f32 0.62831855, %v3557_v21 }
  0xc4   : > { %v2774_v44 = vpop.eup %2773  ;;  %v1028_v61 = vmul.f32 %v1026_v46, %v1026_v46  ;;  %v1724_v63 = vmul.u32 %v1722_v27, %v1719_v23  ;;  %vm1049_vm1 = vcmp.eq.s32.totalorder %v3559_v50, 2  ;;  %v1706_v51 = vsel %vm1702_vm10, %v1686_v43, %v3495_v8 }
  0xc5   : > { %2649 = vmatmul.msk.f32.gmra.mxu1 %vm818_vm2, %v2641_v1  ;;  %v734_v58 = vmul.f32 0.6931472, %v2774_v44  ;;  %v1747_v33 = vmul.u32 %v1743_v56, %v1720_v40  ;;  %v1745_v52 = vmul.u32 %v1743_v56, %v1719_v23  ;;  %vm1045_vm4 = vcmp.lt.s32.totalorder %v3559_v50, 2 }
  0xc6   : > { %v1029_v54 = vmul.f32 -0.001358992, %v1028_v61  ;;  %v1036_v17 = vmul.f32 -0.00019511016, %v1028_v61  ;;  %v1727_v1 = vshll.u32 %v1724_v63, 16  ;;  %v1728_v24 = vshrl.u32 %v1724_v63, 16 }
  0xc7   : > { %v740_v0 = vsel %vm739_vm13, %v737_v62, %v734_v58  ;;  %v1746_v62 = vmul.u32 %v1744_v13, %v1719_v23  ;;  %v1751_v9 = vshll.u32 %v1747_v33, 16  ;;  %v1707_v8 = vsel %vm1705_vm11, %v3499_v60, 2102212464 }
  0xc8   : > { %v788_v2 = vadd.f32 %v740_v0, %v660_v11  ;;  %v1030_v49 = vadd.f32 0.041655596, %v1029_v54  ;;  %v1037_v57 = vadd.f32 0.008332121, %v1036_v17  ;;  %v1726_v11 = vmul.u32 %v1722_v27, %v1720_v40 }
  0xc9   : > { %v1749_v0 = vshll.u32 %v1746_v62, 16  ;;  %v1708_v27 = vsel %vm1704_vm12, %v3497_v14, %v1707_v8  ;;  %vm1046_vm8 = vcmp.eq.s32.totalorder %v3559_v50, 0  ;;  %v1752_v56 = vshrl.u32 %v1747_v33, 16 }
  0xca   : > { %v796_v32 = vsel %vm668_vm0, %v3438_v39, %v788_v2  ;;  %v1721_v39 = vand.u32 65535, %v1717_v59  ;;  %v1031_v20 = vmul.f32 %v1030_v49, %v1028_v61  ;;  %v1038_v58 = vmul.f32 %v1037_v57, %v1028_v61 }
  0xcb   : > { %v2642_v36 = vadd.f32 -0.6931472, %v796_v32  ;;  %v1748_v2 = vmul.u32 %v1744_v13, %v1720_v40  ;;  %vm1753_vm6 = vc.u32 %v1745_v52, %v1749_v0  ;;  %v1755_v48 = vadd.s32 %v1749_v0, %v1745_v52 }
  0xcc   : > { %v1725_v25 = vmul.u32 %v1721_v39, %v1720_v40  ;;  %v1723_v6 = vmul.u32 %v1721_v39, %v1719_v23  ;;  %v1032_v16 = vadd.f32 -0.4999988, %v1031_v20  ;;  %v1039_v18 = vadd.f32 -0.16666654, %v1038_v58 }
  0xcd   : > { %2650 = vmatmul.msk.f32.gmra.mxu1 %vm818_vm2, %v2642_v36  ;;  %v1754_v53 = vsel %vm1753_vm6, 1, %v2873_v12  ;;  %v1750_v23 = vshrl.u32 %v1746_v62, 16  ;;  %vm1757_vm7 = vc.u32 %v1755_v48, %v1751_v9  ;;  %v1981_v17 = vand.u32 2139095040, %v3565_v30 }
  0xce   : > { %v1729_v44 = vshll.u32 %v1725_v25, 16  ;;  %vm1731_vm3 = vc.u32 %v1723_v6, %v1727_v1  ;;  %v1733_v45 = vadd.s32 %v1727_v1, %v1723_v6  ;;  %v1033_v3 = vmul.f32 %v1032_v16, %v1028_v61 }
  0xcf   : > { %v1732_v5 = vsel %vm1731_vm3, 1, %v2873_v12  ;;  %v1040_v7 = vmul.f32 %v1039_v18, %v1028_v61  ;;  %v1730_v36 = vshrl.u32 %v1725_v25, 16  ;;  %v1756_v40 = vadd.s32 %v1754_v53, %v1748_v2  ;;  %v886_v25 = vld [vmem:[%s3031_s26 + $0x10] sm:$0xff]  ;;  %v2164_v18 = vld [vmem:[%s3352_s1] sm:$0xff] }
  0xd0   : > { %v1734_v38 = vadd.s32 %v1732_v5, %v1726_v11  ;;  %vm1735_vm5 = vc.u32 %v1733_v45, %v1729_v44  ;;  %v1034_v32 = vadd.f32 1.0, %v1033_v3  ;;  %v1758_v60 = vsel %vm1757_vm7, 1, %v2873_v12  ;;  %v2799_v45 = vld [vmem:[%s3031_s26] sm:$0xff] }
  0xd1   : > { %v1736_v19 = vsel %vm1735_vm5, 1, %v2873_v12  ;;  %v1041_v34 = vadd.f32 1.0, %v1040_v7  ;;  %v1760_v54 = vadd.s32 %v1758_v60, %v1756_v40  ;;  %vm1043_vm9 = vweird.f32 %v3191_v55 }
  0xd2   : > { %v1738_v10 = vadd.s32 %v1736_v19, %v1734_v38  ;;  %v1050_v39 = vxor.u32 2147483648, %v1034_v32  ;;  %v1709_v14 = vsel %vm1703_vm15, %v1706_v51, %v1708_v27  ;;  %v1982_v49 = vshrl.u32 %v1981_v17, 23 }
  0xd3   : > { %v1042_v61 = vmul.f32 %v1041_v34, %v1026_v46  ;;  %v3590_v46 = vadd.s32 %v1755_v48, %v1751_v9  ;;  %v1761_v63 = vadd.s32 %v1760_v54, %v1750_v23  ;;  %v3595_v11 = vmul.f32 0.62831855, %v886_v25 }
  0xd4   : > { %v1739_v59 = vadd.s32 %v1738_v10, %v1728_v24  ;;  %v2677_v20 = vadd.s32 4294967169, %v1982_v49  ;;  %v1763_v62 = vmul.u32 %v3537_v47, %v1709_v14  ;;  %v693_v55 = vsub.f32 0.0, %v685_v4 }
  0xd5   : > { %v1047_v13 = vxor.u32 2147483648, %v1042_v61  ;;  %v1051_v43 = vsel %vm1049_vm1, %v1050_v39, %v1042_v61  ;;  %v1762_v44 = vadd.s32 %v1761_v63, %v1752_v56  ;;  %vm2148_vm11 = vcmp.lt.f32.partialorder %v2799_v45, 5.0 }
  0xd6   : > { %v3588_v6 = vadd.s32 %v1739_v59, %v1730_v36  ;;  %v1988_v51 = vadd.s32 1, %v2677_v20  ;;  %v1978_v50 = vand.u32 2147483647, %v3565_v30  ;;  %v1211_v52 = vand.u32 2139095040, %v3595_v11 }
  0xd7   : > { %v1048_v57 = vsel %vm1046_vm8, %v1034_v32, %v1047_v13  ;;  %v1766_v33 = vadd.s32 1, %v1762_v44  ;;  %v704_v24 = vmul.f32 1.442695, %v693_v55  ;;  %vm1672_vm5 = vcmp.lt.s32.totalorder %v3308_v15, 0 }
  0xd8   : > { %v1052_v1 = vsel %vm1045_vm4, %v1048_v57, %v1051_v43  ;;  %vm1765_vm10 = vc.u32 %v3588_v6, %v3590_v46  ;;  %vm1989_vm12 = vcmp.gt.s32.totalorder %v1988_v51, 0  ;;  %v1985_v7 = vand.u32 8388607, %v1978_v50 }
  0xd9   : > { %v1053_v58 = vsel %vm1043_vm9, nan, %v1052_v1  ;;  %v1767_v5 = vsel %vm1765_vm10, %v1766_v33, %v1762_v44  ;;  %v1990_v0 = vsel %vm1989_vm12, %v1988_v51, 0  ;;  %v1212_v19 = vshrl.u32 %v1211_v52, 23 }
  0xda   : > { %v2132_v29 = vadd.f32 1.0, %v1053_v58  ;;  %v1768_v47 = vadd.s32 %v1767_v5, %v1763_v62  ;;  %v1992_v2 = vand.u32 31, %v1990_v0  ;;  %v3615_v34 = vshrl.u32 %v1990_v0, 5 }
  0xdb   : > { %2775 = vpow2.f32 %v704_v24  ;;  %v1986_v39 = vor.u32 8388608, %v1985_v7  ;;  %v2662_v25 = vadd.s32 4294967169, %v1212_v19  ;;  %vm3673_vm6 = vcmp.le.f32.partialorder %v1670_v35, 0.7853982 }
  0xdc   : > { %v2140_v16 = vmul.f32 0.5, %v2132_v29  ;;  %v1769_v4 = vadd.s32 536870912, %v1768_v47  ;;  %v1993_v9 = vsub.s32 32, %v1992_v2  ;;  %v1995_v8 = vshll.u32 %v2868_v26, %v1992_v2 }
  0xdd   : > { %v1998_v10 = vshll.u32 %v2869_v28, %v1992_v2  ;;  %v2001_v48 = vshll.u32 %v2870_v31, %v1992_v2  ;;  %v2004_v36 = vshll.u32 %v2867_v22, %v1992_v2  ;;  %v2007_v53 = vshll.u32 %v2871_v37, %v1992_v2 }
  0xde   : > { %v2156_v38 = vsel %vm2148_vm11, %v2140_v16, 0.0  ;;  %v3613_v32 = vshrl.u32 %v1769_v4, 30  ;;  %v1996_v59 = vshrl.u32 %v2869_v28, %v1993_v9  ;;  %v1999_v23 = vshrl.u32 %v2870_v31, %v1993_v9 }
  0xdf   : > { %v2172_v3 = vmul.f32 %v2164_v18, %v2156_v38  ;;  %v2002_v40 = vshrl.u32 %v2867_v22, %v1993_v9  ;;  %v2005_v27 = vshrl.u32 %v2871_v37, %v1993_v9  ;;  %v2008_v60 = vshrl.u32 %v2872_v42, %v1993_v9 }
  0xe0   : > { %v1771_v61 = vshll.u32 %v3613_v32, 30  ;;  %v1997_v56 = vor.u32 %v1996_v59, %v1995_v8  ;;  %v2000_v54 = vor.u32 %v1999_v23, %v1998_v10  ;;  %vm2010_vm13 = vcmp.lt.s32.totalorder %v3615_v34, 1 }
  0xe1   : > { %2182 = vperm.xlu0 %2756, %v2172_v3   ;;  %v2003_v17 = vor.u32 %v2002_v40, %v2001_v48  ;;  %v2006_v43 = vor.u32 %v2005_v27, %v2004_v36  ;;  %v2009_v14 = vor.u32 %v2008_v60, %v2007_v53  ;;  %vm2012_vm14 = vcmp.lt.s32.totalorder %v3615_v34, 3  ;;  %v2776_v57 = vpop.eup %2775 }
  0xe2   : > { %v1772_v13 = vsub.s32 %v1768_v47, %v1771_v61  ;;  %vm2013_vm15 = vcmp.lt.s32.totalorder %v3615_v34, 4  ;;  %vm2011_vm1 = vcmp.lt.s32.totalorder %v3615_v34, 2  ;;  %v3629_v49 = vshll.u32 %v1986_v39, 8 }
  0xe3   : > { %v1994_v1 = vshrl.u32 %v2868_v26, %v1993_v9  ;;  %v2018_v44 = vsel %vm2010_vm13, %v1997_v56, %v2000_v54  ;;  %v2019_v20 = vsel %vm2013_vm15, %v2006_v43, 920167782  ;;  %v1218_v58 = vadd.s32 1, %v2662_v25 }
  0xe4   : > { %vm1773_vm0 = vcmp.lt.s32.totalorder %v1772_v13, 0  ;;  %v1774_v63 = vsub.s32 0, %v1772_v13  ;;  %v2020_v55 = vsel %vm2012_vm14, %v2003_v17, %v2019_v20  ;;  %v2022_v29 = vsel %vm2010_vm13, %v2000_v54, %v2003_v17 }
  0xe5   : > { %v2023_v33 = vsel %vm2013_vm15, %v2009_v14, 1326507024  ;;  %v2021_v45 = vsel %vm2011_vm1, %v2018_v44, %v2020_v55  ;;  %v661_v16 = vmax.f32 %v3540_v41, 0.0  ;;  %v1764_v18 = vadd.s32 %v3590_v46, %v3588_v6 }
  0xe6   : > { %v1775_v62 = vsel %vm1773_vm0, %v1774_v63, %v1772_v13  ;;  %v2024_v52 = vsel %vm2012_vm14, %v2006_v43, %v2023_v33  ;;  %v2015_v5 = vsel %vm2013_vm15, %v2003_v17, 2102212464  ;;  %v2027_v24 = vand.u32 65535, %v3629_v49 }
  0xe7   : > { %v1776_v51 = vclz %v1775_v62  ;;  %v2025_v0 = vsel %vm2011_vm1, %v2022_v29, %v2024_v52  ;;  %v2052_v38 = vshrl.u32 %v2021_v45, 16  ;;  %v2014_v2 = vsel %vm2010_vm13, %v1994_v1, %v1997_v56 }
  0xe8   : > { %v2028_v3 = vshrl.u32 %v3629_v49, 16  ;;  %v1208_v4 = vand.u32 2147483647, %v3595_v11  ;;  %vm1219_vm3 = vcmp.gt.s32.totalorder %v1218_v58, 0  ;;  %v741_v6 = vadd.f32 1.0, %v2776_v57 }
  0xe9   : > { %v2672_v47 = vadd.s32 4294967294, %v1776_v51  ;;  %v2016_v46 = vsel %vm2012_vm14, %v2000_v54, %v2015_v5  ;;  %v2051_v7 = vand.u32 65535, %v2021_v45  ;;  %v744_v9 = vmul.f32 -0.5, %v2776_v57 }
  0xea   : > { %v2029_v8 = vand.u32 65535, %v2025_v0  ;;  %v2030_v10 = vshrl.u32 %v2025_v0, 16  ;;  %v3660_v59 = vmul.u32 %v2052_v38, %v2027_v24  ;;  %v1794_v23 = vsub.s32 4, %v3613_v32 }
  0xeb   : > { %vm2673_vm4 = vcmp.lt.s32.totalorder %v2672_v47, 0  ;;  %2777 = vlog2.f32 %v741_v6  ;;  %v3665_v40 = vsel %vm2011_vm1, %v2014_v2, %v2016_v46  ;;  %v3668_v61 = vsel %vm1219_vm3, %v1218_v58, 0 }
  0xec   : > { %v1779_v19 = vsel %vm2673_vm4, 0, %v2672_v47  ;;  %v745_v60 = vadd.f32 1.0, %v744_v9  ;;  %v747_v56 = vand.u32 2147483647, %v2776_v57  ;;  %v2031_v54 = vmul.u32 %v2029_v8, %v2027_v24 }
  0xed   : > { %v1780_v48 = vsub.s32 32, %v1779_v19  ;;  %v1781_v36 = vshll.u32 %v1772_v13, %v1779_v19  ;;  %v1784_v53 = vsub.s32 4294967266, %v1779_v19  ;;  %v2032_v17 = vmul.u32 %v2030_v10, %v2027_v24 }
  0xee   : > { %v2033_v25 = vmul.u32 %v2029_v8, %v2028_v3  ;;  %v2055_v13 = vmul.u32 %v2051_v7, %v2028_v3  ;;  %vm669_vm7 = vcmp.ne.f32.partialorder %v3540_v41, %v3540_v41  ;;  %v2053_v63 = vmul.u32 %v2051_v7, %v2027_v24 }
  0xef   : > { %v1782_v39 = vshrl.u32 %v1764_v18, %v1780_v48  ;;  %v1785_v27 = vadd.s32 127, %v1784_v53  ;;  %v2057_v1 = vshll.u32 %v3660_v59, 16  ;;  %v2034_v44 = vmul.u32 %v2030_v10, %v2028_v3 }
  0xf0   : > { %v2035_v20 = vshll.u32 %v2032_v17, 16  ;;  %v2037_v58 = vshll.u32 %v2033_v25, 16  ;;  %v2056_v62 = vmul.u32 %v2052_v38, %v2028_v3  ;;  %v746_v33 = vmul.f32 %v2776_v57, %v745_v60 }
  0xf1   : > { %v1783_v34 = vor.u32 %v1782_v39, %v1781_v36  ;;  %v1786_v14 = vshll.u32 %v1785_v27, 23  ;;  %vm3680_vm8 = vcmp.lt.f32.partialorder %v747_v56, 0.0004427343  ;;  %v2778_v51 = vpop.eup %2777  ;;  %v2036_v45 = vshrl.u32 %v2032_v17, 16 }
  0xf2   : > { %vm2039_vm9 = vc.u32 %v2031_v54, %v2035_v20  ;;  %v2041_v52 = vadd.s32 %v2035_v20, %v2031_v54  ;;  %v2059_v18 = vshll.u32 %v2055_v13, 16  ;;  %v743_v47 = vmul.f32 0.6931472, %v2778_v51 }
  0xf3   : > { %v1787_v55 = vor.u32 4788187, %v1786_v14  ;;  %v1790_v29 = vcvt.s32.f32 %v1783_v34  ;;  %v2040_v0 = vsel %vm2039_vm9, 1, %v2873_v12  ;;  %vm2061_vm10 = vc.u32 %v2053_v63, %v2057_v1 }
  0xf4   : > { %v2042_v24 = vadd.s32 %v2040_v0, %v2034_v44  ;;  %vm2043_vm11 = vc.u32 %v2041_v52, %v2037_v58  ;;  %v2062_v38 = vsel %vm2061_vm10, 1, %v2873_v12  ;;  %v2063_v2 = vadd.s32 %v2057_v1, %v2053_v63 }
  0xf5   : > { %v1788_v5 = vand.u32 2147483647, %v1787_v55  ;;  %v749_v3 = vsel %vm3680_vm8, %v746_v33, %v743_v47  ;;  %v2044_v6 = vsel %vm2043_vm11, 1, %v2873_v12  ;;  %v2064_v46 = vadd.s32 %v2062_v38, %v2056_v62 }
  0xf6   : > { %v789_v7 = vadd.f32 %v749_v3, %v661_v16  ;;  %v2038_v19 = vshrl.u32 %v2033_v25, 16  ;;  %v2046_v9 = vadd.s32 %v2044_v6, %v2042_v24  ;;  %vm2065_vm12 = vc.u32 %v2063_v2, %v2059_v18 }
  0xf7   : > { %v1791_v57 = vmul.f32 %v1790_v29, %v1788_v5  ;;  %v2058_v10 = vshrl.u32 %v3660_v59, 16  ;;  %v2066_v48 = vsel %vm2065_vm12, 1, %v2873_v12  ;;  %v1222_v36 = vand.u32 31, %v3668_v61 }
  0xf8   : > { %v797_v53 = vsel %vm669_vm7, %v3540_v41, %v789_v7  ;;  %v2047_v39 = vadd.s32 %v2046_v9, %v2036_v45  ;;  %v2060_v27 = vshrl.u32 %v2055_v13, 16  ;;  %v2068_v60 = vadd.s32 %v2066_v48, %v2064_v46 }
  0xf9   : > { %v1792_v8 = vxor.u32 2147483648, %v1791_v57  ;;  %v2643_v56 = vadd.f32 -0.6931472, %v797_v53  ;;  %v3700_v54 = vadd.s32 %v2063_v2, %v2059_v18  ;;  %v3702_v17 = vsub.s32 32, %v1222_v36 }
  0xfa   : > { %v3707_v25 = vadd.s32 %v2047_v39, %v2038_v19  ;;  %v2069_v41 = vadd.s32 %v2068_v60, %v2058_v10  ;;  %v1215_v13 = vand.u32 8388607, %v1208_v4  ;;  %v1795_v14 = vsel %vm1672_vm5, %v1794_v23, %v3613_v32 }
  0xfb   : > { %v1793_v16 = vsel %vm1672_vm5, %v1792_v8, %v1791_v57  ;;  %2651 = vmatmul.msk.f32.gmra.mxu1 %vm818_vm2, %v2643_v56  ;;  %v2071_v63 = vmul.u32 %v3629_v49, %v3665_v40  ;;  %v1225_v1 = vshll.u32 %v2868_v26, %v1222_v36  ;;  %v1226_v44 = vshrl.u32 %v2869_v28, %v3702_v17 }
  0xfc   : > { %v1796_v59 = vsel %vm3673_vm6, %v3308_v15, %v1793_v16  ;;  %v2070_v62 = vadd.s32 %v2069_v41, %v2060_v27  ;;  %vm2073_vm13 = vc.u32 %v3707_v25, %v3700_v54  ;;  %v1228_v55 = vshll.u32 %v2869_v28, %v1222_v36 }
  0xfd   : > { %v1798_v34 = vmul.f32 %v1796_v59, %v1796_v59  ;;  %v1229_v29 = vshrl.u32 %v2870_v31, %v3702_v17  ;;  %v1231_v32 = vshll.u32 %v2870_v31, %v1222_v36  ;;  %v1232_v49 = vshrl.u32 %v2867_v22, %v3702_v17 }
  0xfe   : > { %v2074_v33 = vadd.s32 1, %v2070_v62  ;;  %v1234_v35 = vshll.u32 %v2867_v22, %v1222_v36  ;;  %v1797_v51 = vsel %vm3673_vm6, 0, %v1795_v14  ;;  %v1216_v45 = vor.u32 8388608, %v1215_v13 }
  0xff   : > { %v1799_v20 = vmul.f32 -0.001358992, %v1798_v34  ;;  %v1806_v58 = vmul.f32 -0.00019511016, %v1798_v34  ;;  %v3734_v52 = vshrl.u32 %v3668_v61, 5  ;;  %v1235_v18 = vshrl.u32 %v2871_v37, %v3702_v17 }
 0x100   : > { %v2075_v0 = vsel %vm2073_vm13, %v2074_v33, %v2070_v62  ;;  %v1237_v24 = vshll.u32 %v2871_v37, %v1222_v36  ;;  %v3739_v2 = vor.u32 %v1226_v44, %v1225_v1  ;;  %v1238_v43 = vshrl.u32 %v2872_v42, %v3702_v17 }
 0x101   : > { %v1800_v23 = vadd.f32 0.041655596, %v1799_v20  ;;  %v1807_v40 = vadd.f32 0.008332121, %v1806_v58  ;;  %v2076_v38 = vadd.s32 %v2075_v0, %v2071_v63  ;;  %v1236_v57 = vor.u32 %v1235_v18, %v1234_v35 }
 0x102   : > { %v3743_v46 = vor.u32 %v1229_v29, %v1228_v55  ;;  %v3745_v61 = vor.u32 %v1232_v49, %v1231_v32  ;;  %v1814_v7 = vand.u32 3, %v1797_v51  ;;  %vm1240_vm14 = vcmp.lt.s32.totalorder %v3734_v52, 1  ;;  %v646_v32 = vpop.f32.mrf.mxu0 }
 0x103   : > { %v1801_v5 = vmul.f32 %v1800_v23, %v1798_v34  ;;  %v1808_v47 = vmul.f32 %v1807_v40, %v1798_v34  ;;  %v2077_v19 = vadd.s32 536870912, %v2076_v38  ;;  %vm1242_vm15 = vcmp.lt.s32.totalorder %v3734_v52, 3 }
 0x104   : > { %v1239_v10 = vor.u32 %v1238_v43, %v1237_v24  ;;  %vm1243_vm0 = vcmp.lt.s32.totalorder %v3734_v52, 4  ;;  %vm1241_vm1 = vcmp.lt.s32.totalorder %v3734_v52, 2  ;;  %v1248_v27 = vsel %vm1240_vm14, %v3739_v2, %v3743_v46  ;;  %v3790_v24 = vld [vmem:[%s4309_s7] ss:$0 sm:$0xff] }
 0x105   : > { %v1802_v3 = vadd.f32 -0.4999988, %v1801_v5  ;;  %v1809_v6 = vadd.f32 -0.16666654, %v1808_v47  ;;  %v3750_v48 = vshrl.u32 %v2077_v19, 30  ;;  %vm1813_vm3 = vweird.f32 %v3308_v15 }
 0x106   : > { %v1249_v36 = vsel %vm1243_vm0, %v1236_v57, 920167782  ;;  %vm1819_vm4 = vcmp.eq.s32.totalorder %v1814_v7, 2  ;;  %v1252_v56 = vsel %vm1240_vm14, %v3743_v46, %v3745_v61  ;;  %v1253_v13 = vsel %vm1243_vm0, %v1239_v10, 1326507024 }
 0x107   : > { %v1803_v9 = vmul.f32 %v1802_v3, %v1798_v34  ;;  %v1810_v8 = vmul.f32 %v1809_v6, %v1798_v34  ;;  %v1250_v60 = vsel %vm1242_vm15, %v3745_v61, %v1249_v36  ;;  %v2079_v16 = vshll.u32 %v3750_v48, 30  ;;  %v2801_v6 = vld [vmem:[%s3031_s26 + $0x28] sm:$0xff] }
 0x108   : > { %v3770_v14 = vshll.u32 %v1216_v45, 8  ;;  %vm1816_vm5 = vcmp.eq.s32.totalorder %v1814_v7, 0  ;;  %v1251_v1 = vsel %vm1241_vm1, %v1248_v27, %v1250_v60  ;;  %v1254_v44 = vsel %vm1242_vm15, %v1236_v57, %v1253_v13 }
 0x109   : > { %v1804_v53 = vadd.f32 1.0, %v1803_v9  ;;  %v1811_v39 = vadd.f32 1.0, %v1810_v8  ;;  %v3772_v63 = vsub.s32 %v2076_v38, %v2079_v16  ;;  %vm1815_vm6 = vcmp.lt.s32.totalorder %v1814_v7, 2  ;;  %v2169_v8 = vld [vmem:[%s3352_s1 + $0x28] sm:$0xff] }
 0x10a   : > { %v1257_v55 = vand.u32 65535, %v3770_v14  ;;  %v1258_v29 = vshrl.u32 %v3770_v14, 16  ;;  %v1282_v33 = vshrl.u32 %v1251_v1, 16  ;;  %v1281_v45 = vand.u32 65535, %v1251_v1 }
 0x10b   : > { %v1812_v34 = vmul.f32 %v1811_v39, %v1796_v59  ;;  %v1820_v41 = vxor.u32 2147483648, %v1804_v53  ;;  %v1255_v59 = vsel %vm1241_vm1, %v1252_v56, %v1254_v44  ;;  %vm2081_vm7 = vcmp.lt.s32.totalorder %v3772_v63, 0 }
 0x10c   : > { %v2082_v62 = vsub.s32 0, %v3772_v63  ;;  %v1259_v23 = vand.u32 65535, %v1255_v59  ;;  %v1260_v40 = vshrl.u32 %v1255_v59, 16  ;;  %v3793_v38 = vadd.f32 %v3790_v24, %v646_v32  ;;  %v3813_v32 = vld [vmem:[%s3031_s26 + $0x20] sm:$0xff] }
 0x10d   : > { %v1817_v20 = vxor.u32 2147483648, %v1812_v34  ;;  %v1821_v58 = vsel %vm1819_vm4, %v1820_v41, %v1812_v34  ;;  %v3797_v3 = vmul.u32 %v1282_v33, %v1257_v55  ;;  %vm2153_vm8 = vcmp.lt.f32.partialorder %v2801_v6, 5.0 }
 0x10e   : > { %v2083_v51 = vsel %vm2081_vm7, %v2082_v62, %v3772_v63  ;;  %v1261_v47 = vmul.u32 %v1259_v23, %v1257_v55  ;;  %v1262_v0 = vmul.u32 %v1260_v40, %v1257_v55  ;;  %v3795_v43 = vmul.u32 %v1259_v23, %v1258_v29 }
 0x10f   : > { %v1818_v49 = vsel %vm1816_vm5, %v1804_v53, %v1817_v20  ;;  %v2084_v5 = vclz %v2083_v51  ;;  %v2072_v15 = vadd.s32 %v3700_v54, %v3707_v25  ;;  %v1264_v10 = vmul.u32 %v1260_v40, %v1258_v29 }
 0x110   : > { %v1822_v35 = vsel %vm1815_vm6, %v1818_v49, %v1821_v58  ;;  %v1265_v19 = vshll.u32 %v1262_v0, 16  ;;  %v1283_v36 = vmul.u32 %v1281_v45, %v1257_v55  ;;  %v3803_v53 = vmul.u32 %v1281_v45, %v1258_v29 }
 0x111   : > { %v1823_v18 = vsel %vm1813_vm3, nan, %v1822_v35  ;;  %v2678_v7 = vadd.s32 4294967294, %v2084_v5  ;;  %v1267_v39 = vshll.u32 %v3795_v43, 16  ;;  %v1287_v27 = vshll.u32 %v3797_v3, 16  ;;  %v649_v5 = vpop.f32.mrf.mxu0 }
 0x112   : > { %v2137_v57 = vadd.f32 1.0, %v1823_v18  ;;  %vm1269_vm10 = vc.u32 %v1261_v47, %v1265_v19  ;;  %v1271_v54 = vadd.s32 %v1265_v19, %v1261_v47  ;;  %v686_v1 = vand.u32 2147483647, %v3793_v38 }
 0x113   : > { %vm2679_vm9 = vcmp.lt.s32.totalorder %v2678_v7, 0  ;;  %v1270_v56 = vsel %vm1269_vm10, 1, %v2873_v12  ;;  %v1224_v44 = vshrl.u32 %v2868_v26, %v3702_v17  ;;  %v1286_v58 = vmul.u32 %v1282_v33, %v1258_v29 }
 0x114   : > { %v2145_v9 = vmul.f32 0.5, %v2137_v57  ;;  %v2087_v16 = vsel %vm2679_vm9, 0, %v2678_v7  ;;  %v1272_v20 = vadd.s32 %v1270_v56, %v1264_v10  ;;  %v1266_v55 = vshrl.u32 %v1262_v0, 16 }
 0x115   : > { %v2088_v34 = vsub.s32 32, %v2087_v16  ;;  %v2089_v41 = vshll.u32 %v3772_v63, %v2087_v16  ;;  %v2092_v13 = vsub.s32 4294967266, %v2087_v16  ;;  %vm1273_vm11 = vc.u32 %v1271_v54, %v1267_v39 }
 0x116   : > { %v2161_v60 = vsel %vm2153_vm8, %v2145_v9, 0.0  ;;  %v1245_v49 = vsel %vm1243_vm0, %v3745_v61, 2102212464  ;;  %v1274_v63 = vsel %vm1273_vm11, 1, %v2873_v12  ;;  %v1289_v23 = vshll.u32 %v3803_v53, 16 }
 0x117   : > { %v2177_v25 = vmul.f32 %v2169_v8, %v2161_v60  ;;  %v2090_v59 = vshrl.u32 %v2072_v15, %v2088_v34  ;;  %v2093_v62 = vadd.s32 127, %v2092_v13  ;;  %vm1291_vm12 = vc.u32 %v1283_v36, %v1287_v27  ;;  %v3857_v34 = vld [vmem:[%s3031_s26 + $0x8] sm:$0xff] }
 0x118   : > { %v1276_v35 = vadd.s32 %v1274_v63, %v1272_v20  ;;  %v1292_v29 = vsel %vm1291_vm12, 1, %v2873_v12  ;;  %v2102_v33 = vsub.s32 4, %v3750_v48  ;;  %v1293_v51 = vadd.s32 %v1287_v27, %v1283_v36 }
 0x119   : > { %2207 = vperm.xlu1 %2757, %v2177_v25   ;;  %v2091_v40 = vor.u32 %v2090_v59, %v2089_v41  ;;  %v2094_v17 = vshll.u32 %v2093_v62, 23  ;;  %v1294_v45 = vadd.s32 %v1292_v29, %v1286_v58  ;;  %v3823_v18 = vmul.f32 0.62831855, %v3813_v32 }
 0x11a   : > { %v1268_v0 = vshrl.u32 %v3795_v43, 16  ;;  %v1277_v57 = vadd.s32 %v1276_v35, %v1266_v55  ;;  %vm1980_vm13 = vcmp.lt.s32.totalorder %v3565_v30, 0  ;;  %v1244_v6 = vsel %vm1240_vm14, %v1224_v44, %v3739_v2 }
 0x11b   : > { %v2095_v47 = vor.u32 4788187, %v2094_v17  ;;  %v2098_v61 = vcvt.s32.f32 %v2091_v40  ;;  %v1288_v15 = vshrl.u32 %v3797_v3, 16  ;;  %vm1295_vm0 = vc.u32 %v1293_v51, %v1289_v23 }
 0x11c   : > { %v1246_v19 = vsel %vm1242_vm15, %v3743_v46, %v1245_v49  ;;  %v1296_v9 = vsel %vm1295_vm0, 1, %v2873_v12  ;;  %v1519_v8 = vand.u32 2139095040, %v3823_v18  ;;  %v3837_v43 = vadd.f32 %v3790_v24, %v649_v5 }
 0x11d   : > { %v2096_v7 = vand.u32 2147483647, %v2095_v47  ;;  %v2103_v2 = vsel %vm1980_vm13, %v2102_v33, %v3750_v48  ;;  %v1290_v3 = vshrl.u32 %v3803_v53, 16  ;;  %v1298_v10 = vadd.s32 %v1296_v9, %v1294_v45 }
 0x11e   : > { %v3843_v39 = vadd.s32 %v1277_v57, %v1268_v0  ;;  %v3845_v27 = vadd.s32 %v1293_v51, %v1289_v23  ;;  %v1520_v46 = vshrl.u32 %v1519_v8, 23  ;;  %v694_v60 = vsub.f32 0.0, %v686_v1 }
 0x11f   : > { %v2099_v36 = vmul.f32 %v2098_v61, %v2096_v7  ;;  %vm3849_vm14 = vcmp.le.f32.partialorder %v1978_v50, 0.7853982  ;;  %v1247_v56 = vsel %vm1241_vm1, %v1244_v6, %v1246_v19  ;;  %v1299_v48 = vadd.s32 %v1298_v10, %v1288_v15 }
 0x120   : > { %v1516_v53 = vand.u32 2147483647, %v3823_v18  ;;  %v2668_v25 = vadd.s32 4294967169, %v1520_v46  ;;  %v687_v41 = vand.u32 2147483647, %v3837_v43  ;;  %v2105_v13 = vsel %vm3849_vm14, 0, %v2103_v2 }
 0x121   : > { %v2100_v54 = vxor.u32 2147483648, %v2099_v36  ;;  %v1300_v1 = vadd.s32 %v1299_v48, %v1290_v3  ;;  %v1301_v44 = vmul.u32 %v3770_v14, %v1247_v56  ;;  %vm1303_vm15 = vc.u32 %v3843_v39, %v3845_v27 }
 0x122   : > { %v1526_v52 = vadd.s32 1, %v2668_v25  ;;  %v706_v20 = vmul.f32 1.442695, %v694_v60  ;;  %v3871_v62 = vmul.f32 0.62831855, %v3857_v34  ;;  %v695_v63 = vsub.f32 0.0, %v687_v41 }
 0x123   : > { %v2101_v50 = vsel %vm1980_vm13, %v2100_v54, %v2099_v36  ;;  %v1304_v59 = vadd.s32 1, %v1300_v1  ;;  %v1523_v49 = vand.u32 8388607, %v1516_v53  ;;  %v3875_v14 = vand.u32 3, %v2105_v13 }
 0x124   : > { %v2104_v58 = vsel %vm3849_vm14, %v3565_v30, %v2101_v50  ;;  %vm1527_vm1 = vcmp.gt.s32.totalorder %v1526_v52, 0  ;;  %v662_v33 = vmax.f32 %v3793_v38, 0.0  ;;  %2779 = vpow2.f32 %v706_v20 }
 0x125   : > { %v2106_v55 = vmul.f32 %v2104_v58, %v2104_v58  ;;  %v1305_v23 = vsel %vm1303_vm15, %v1304_v59, %v1300_v1  ;;  %v1528_v40 = vsel %vm1527_vm1, %v1526_v52, 0  ;;  %v1057_v45 = vand.u32 2139095040, %v3871_v62 }
 0x126   : > { %v1306_v29 = vadd.s32 %v1305_v23, %v1301_v44  ;;  %v1530_v51 = vand.u32 31, %v1528_v40  ;;  %v1524_v0 = vor.u32 8388608, %v1523_v49  ;;  %v3879_v57 = vmul.f32 1.442695, %v695_v63 }
 0x127   : > { %v2107_v17 = vmul.f32 -0.001358992, %v2106_v55  ;;  %v2114_v35 = vmul.f32 -0.00019511016, %v2106_v55  ;;  %vm2127_vm3 = vcmp.eq.s32.totalorder %v3875_v14, 2  ;;  %v3882_v6 = vshrl.u32 %v1528_v40, 5 }
 0x128   : > { %v1307_v61 = vadd.s32 536870912, %v1306_v29  ;;  %v3884_v15 = vsub.s32 32, %v1530_v51  ;;  %v1533_v8 = vshll.u32 %v2868_v26, %v1530_v51  ;;  %vm2124_vm4 = vcmp.eq.s32.totalorder %v3875_v14, 0 }
 0x129   : > { %v2108_v5 = vadd.f32 0.041655596, %v2107_v17  ;;  %v2115_v47 = vadd.f32 0.008332121, %v2114_v35  ;;  %v1536_v3 = vshll.u32 %v2869_v28, %v1530_v51  ;;  %v1058_v36 = vshrl.u32 %v1057_v45, 23 }
 0x12a   : > { %v1308_v9 = vshrl.u32 %v1307_v61, 30  ;;  %v1534_v2 = vshrl.u32 %v2869_v28, %v3884_v15  ;;  %v1537_v10 = vshrl.u32 %v2870_v31, %v3884_v15  ;;  %vm2123_vm5 = vcmp.lt.s32.totalorder %v3875_v14, 2  ;;  %v3896_v48 = vpop.eup %2779 }
 0x12b   : > { %v2109_v7 = vmul.f32 %v2108_v5, %v2106_v55  ;;  %v2116_v19 = vmul.f32 %v2115_v47, %v2106_v55  ;;  %v3894_v56 = vshll.u32 %v1524_v0, 8  ;;  %vm2121_vm6 = vweird.f32 %v3565_v30 }
 0x12c   : > { %v1309_v16 = vshll.u32 %v1308_v9, 30  ;;  %vm1210_vm7 = vcmp.lt.s32.totalorder %v3595_v11, 0  ;;  %v1539_v54 = vshll.u32 %v2870_v31, %v1530_v51  ;;  %v1540_v25 = vshrl.u32 %v2867_v22, %v3884_v15 }
 0x12d   : > { %v2110_v46 = vadd.f32 -0.4999988, %v2109_v7  ;;  %v2117_v60 = vadd.f32 -0.16666654, %v2116_v19  ;;  %v1542_v41 = vshll.u32 %v2867_v22, %v1530_v51  ;;  %vm1548_vm8 = vcmp.lt.s32.totalorder %v3882_v6, 1 }
 0x12e   : > { %v3905_v50 = vsub.s32 %v1306_v29, %v1309_v16  ;;  %v3907_v44 = vor.u32 %v1534_v2, %v1533_v8  ;;  %v3909_v52 = vor.u32 %v1537_v10, %v1536_v3  ;;  %v1543_v20 = vshrl.u32 %v2871_v37, %v3884_v15 }
 0x12f   : > { %v2111_v13 = vmul.f32 %v2110_v46, %v2106_v55  ;;  %v2118_v1 = vmul.f32 %v2117_v60, %v2106_v55  ;;  %v1545_v59 = vshll.u32 %v2871_v37, %v1530_v51  ;;  %v1546_v49 = vshrl.u32 %v2872_v42, %v3884_v15 }
 0x130   : > { %vm1311_vm9 = vcmp.lt.s32.totalorder %v3905_v50, 0  ;;  %v1312_v55 = vsub.s32 0, %v3905_v50  ;;  %v1332_v40 = vsub.s32 4, %v1308_v9  ;;  %v1541_v17 = vor.u32 %v1540_v25, %v1539_v54 }
 0x131   : > { %v2112_v63 = vadd.f32 1.0, %v2111_v13  ;;  %v2119_v23 = vadd.f32 1.0, %v2118_v1  ;;  %v1544_v35 = vor.u32 %v1543_v20, %v1542_v41  ;;  %vm1550_vm10 = vcmp.lt.s32.totalorder %v3882_v6, 3 }
 0x132   : > { %vm2155_vm11 = vcmp.lt.f32.partialorder %v3557_v21, 5.0  ;;  %v1313_v51 = vsel %vm1311_vm9, %v1312_v55, %v3905_v50  ;;  %vm1551_vm12 = vcmp.lt.s32.totalorder %v3882_v6, 4  ;;  %vm3924_vm13 = vcmp.le.f32.partialorder %v1208_v4, 0.7853982  ;;  %v2171_v55 = vld [vmem:[%s3352_s1 + $0x38] sm:$0xff] }
 0x133   : > { %v2120_v29 = vmul.f32 %v2119_v23, %v2104_v58  ;;  %v2128_v45 = vxor.u32 2147483648, %v2112_v63  ;;  %v1302_v47 = vadd.s32 %v3845_v27, %v3843_v39  ;;  %v1314_v61 = vclz %v1313_v51 }
 0x134   : > { %v1547_v0 = vor.u32 %v1546_v49, %v1545_v59  ;;  %vm1549_vm0 = vcmp.lt.s32.totalorder %v3882_v6, 2  ;;  %v1556_v19 = vsel %vm1548_vm8, %v3907_v44, %v3909_v52  ;;  %v1557_v4 = vsel %vm1551_vm12, %v1544_v35, 920167782 }
 0x135   : > { %v2125_v58 = vxor.u32 2147483648, %v2120_v29  ;;  %v2129_v7 = vsel %vm2127_vm3, %v2128_v45, %v2120_v29  ;;  %v2663_v8 = vadd.s32 4294967294, %v1314_v61  ;;  %v1558_v39 = vsel %vm1550_vm10, %v1541_v17, %v1557_v4 }
 0x136   : > { %v1054_v27 = vand.u32 2147483647, %v3871_v62  ;;  %v2659_v2 = vadd.s32 4294967169, %v1058_v36  ;;  %v3946_v10 = vsel %vm1210_vm7, %v1332_v40, %v1308_v9  ;;  %v1565_v46 = vand.u32 65535, %v3894_v56 }
 0x137   : > { %v2126_v3 = vsel %vm2124_vm4, %v2112_v63, %v2125_v58  ;;  %v1566_v60 = vshrl.u32 %v3894_v56, 16  ;;  %vm2664_vm14 = vcmp.lt.s32.totalorder %v2663_v8, 0  ;;  %v1559_v54 = vsel %vm1549_vm0, %v1556_v19, %v1558_v39 }
 0x138   : > { %v2130_v16 = vsel %vm2123_vm5, %v2126_v3, %v2129_v7  ;;  %v1561_v36 = vsel %vm1551_vm12, %v1547_v0, 1326507024  ;;  %v1317_v9 = vsel %vm2664_vm14, 0, %v2663_v8  ;;  %v750_v41 = vadd.f32 1.0, %v3896_v48 }
 0x139   : > { %v2131_v25 = vsel %vm2121_vm6, nan, %v2130_v16  ;;  %v753_v13 = vmul.f32 -0.5, %v3896_v48  ;;  %v1318_v20 = vsub.s32 32, %v1317_v9  ;;  %v1319_v14 = vshll.u32 %v3905_v50, %v1317_v9 }
 0x13a   : > { %v2139_v1 = vadd.f32 1.0, %v2131_v25  ;;  %v1322_v59 = vsub.s32 4294967266, %v1317_v9  ;;  %2781 = vlog2.f32 %v750_v41  ;;  %v1532_v49 = vshrl.u32 %v2868_v26, %v3884_v15 }
 0x13b   : > { %v3965_v63 = vand.u32 8388607, %v1054_v27  ;;  %v3967_v30 = vadd.s32 1, %v2659_v2  ;;  %v1320_v40 = vshrl.u32 %v1302_v47, %v1318_v20  ;;  %v1560_v45 = vsel %vm1548_vm8, %v3909_v52, %v1541_v17 }
 0x13c   : > { %v2147_v23 = vmul.f32 0.5, %v2139_v1  ;;  %v1323_v29 = vadd.s32 127, %v1322_v59  ;;  %v1335_v50 = vsel %vm3924_vm13, 0, %v3946_v10  ;;  %v754_v51 = vadd.f32 1.0, %v753_v13 }
 0x13d   : > { %v1562_v15 = vsel %vm1550_vm10, %v1544_v35, %v1561_v36  ;;  %v1590_v61 = vshrl.u32 %v1559_v54, 16  ;;  %v1321_v58 = vor.u32 %v1320_v40, %v1319_v14  ;;  %vm670_vm15 = vcmp.ne.f32.partialorder %v3793_v38, %v3793_v38 }
 0x13e   : > { %v2163_v0 = vsel %vm2155_vm11, %v2147_v23, 0.0  ;;  %v1324_v7 = vshll.u32 %v1323_v29, 23  ;;  %v1553_v47 = vsel %vm1551_vm12, %v1541_v17, 2102212464  ;;  %v756_v4 = vand.u32 2147483647, %v3896_v48 }
 0x13f   : > { %v2179_v19 = vmul.f32 %v2171_v55, %v2163_v0  ;;  %v1563_v8 = vsel %vm1549_vm0, %v1560_v45, %v1562_v15  ;;  %v1589_v39 = vand.u32 65535, %v1559_v54  ;;  %vm1065_vm1 = vcmp.gt.s32.totalorder %v3967_v30, 0 }
 0x140   : > { %v1325_v35 = vor.u32 4788187, %v1324_v7  ;;  %v1328_v21 = vcvt.s32.f32 %v1321_v58  ;;  %v1567_v2 = vand.u32 65535, %v1563_v8  ;;  %v1568_v3 = vshrl.u32 %v1563_v8, 16  ;;  %v2782_v16 = vpop.eup %2781 }
 0x141   : > { %2217 = vperm.xlu2 %2758, %v2179_v19   ;;  %v755_v36 = vmul.f32 %v3896_v48, %v754_v51  ;;  %v1552_v17 = vsel %vm1548_vm8, %v1532_v49, %v3907_v44  ;;  %v1554_v25 = vsel %vm1550_vm10, %v3909_v52, %v1553_v47  ;;  %v1592_v9 = vmul.u32 %v1590_v61, %v1565_v46 }
 0x142   : > { %v1326_v54 = vand.u32 2147483647, %v1325_v35  ;;  %v752_v41 = vmul.f32 0.6931472, %v2782_v16  ;;  %v1569_v13 = vmul.u32 %v1567_v2, %v1565_v46  ;;  %v1570_v1 = vmul.u32 %v1568_v3, %v1565_v46 }
 0x143   : > { %vm757_vm3 = vcmp.lt.f32.partialorder %v756_v4, 0.0004427343  ;;  %v1571_v20 = vmul.u32 %v1567_v2, %v1566_v60  ;;  %v1591_v14 = vmul.u32 %v1589_v39, %v1565_v46  ;;  %v1593_v59 = vmul.u32 %v1589_v39, %v1566_v60 }
 0x144   : > { %v1329_v23 = vmul.f32 %v1328_v21, %v1326_v54  ;;  %v758_v55 = vsel %vm757_vm3, %v755_v36, %v752_v41  ;;  %v1572_v48 = vmul.u32 %v1568_v3, %v1566_v60  ;;  %v1573_v40 = vshll.u32 %v1570_v1, 16 }
 0x145   : > { %v790_v44 = vadd.f32 %v758_v55, %v662_v33  ;;  %v1575_v49 = vshll.u32 %v1571_v20, 16  ;;  %v1594_v29 = vmul.u32 %v1590_v61, %v1566_v60  ;;  %v1595_v45 = vshll.u32 %v1592_v9, 16 }
 0x146   : > { %v1330_v52 = vxor.u32 2147483648, %v1329_v23  ;;  %v1574_v51 = vshrl.u32 %v1570_v1, 16  ;;  %vm1577_vm4 = vc.u32 %v1569_v13, %v1573_v40  ;;  %v1579_v15 = vadd.s32 %v1573_v40, %v1569_v13 }
 0x147   : > { %v798_v46 = vsel %vm670_vm15, %v3793_v38, %v790_v44  ;;  %v1576_v0 = vshrl.u32 %v1571_v20, 16  ;;  %v1578_v58 = vsel %vm1577_vm4, 1, %v2873_v12  ;;  %v1597_v7 = vshll.u32 %v1593_v59, 16 }
 0x148   : > { %v1331_v47 = vsel %vm1210_vm7, %v1330_v52, %v1329_v23  ;;  %v2644_v33 = vadd.f32 -0.6931472, %v798_v46  ;;  %v1580_v19 = vadd.s32 %v1578_v58, %v1572_v48  ;;  %vm1581_vm5 = vc.u32 %v1579_v15, %v1575_v49 }
 0x149   : > { %v4007_v60 = vsel %vm3924_vm13, %v3595_v11, %v1331_v47  ;;  %v1582_v61 = vsel %vm1581_vm5, 1, %v2873_v12  ;;  %vm1599_vm6 = vc.u32 %v1591_v14, %v1595_v45  ;;  %v1601_v4 = vadd.s32 %v1595_v45, %v1591_v14 }
 0x14a   : > { %v1336_v38 = vmul.f32 %v4007_v60, %v4007_v60  ;;  %2652 = vmatmul.msk.f32.gmra.mxu1 %vm818_vm2, %v2644_v33  ;;  %v1584_v8 = vadd.s32 %v1582_v61, %v1580_v19  ;;  %v1600_v39 = vsel %vm1599_vm6, 1, %v2873_v12  ;;  %v1066_v35 = vsel %vm1065_vm1, %v3967_v30, 0 }
 0x14b   : > { %v1555_v21 = vsel %vm1549_vm0, %v1552_v17, %v1554_v25  ;;  %v1596_v2 = vshrl.u32 %v1592_v9, 16  ;;  %v1602_v3 = vadd.s32 %v1600_v39, %v1594_v29  ;;  %vm1603_vm7 = vc.u32 %v1601_v4, %v1597_v7 }
 0x14c   : > { %v1337_v16 = vmul.f32 -0.001358992, %v1336_v38  ;;  %v1344_v36 = vmul.f32 -0.00019511016, %v1336_v38  ;;  %v1585_v54 = vadd.s32 %v1584_v8, %v1574_v51  ;;  %v1604_v41 = vsel %vm1603_vm7, 1, %v2873_v12 }
 0x14d   : > { %v1598_v13 = vshrl.u32 %v1593_v59, 16  ;;  %v4020_v1 = vadd.s32 %v1601_v4, %v1597_v7  ;;  %v1606_v20 = vadd.s32 %v1604_v41, %v1602_v3  ;;  %v1068_v14 = vand.u32 31, %v1066_v35 }
 0x14e   : > { %v1338_v23 = vadd.f32 0.041655596, %v1337_v16  ;;  %v1345_v55 = vadd.f32 0.008332121, %v1344_v36  ;;  %v1352_v6 = vand.u32 3, %v1335_v50  ;;  %v4026_v30 = vadd.s32 %v1585_v54, %v1576_v0 }
 0x14f   : > { %v1607_v17 = vadd.s32 %v1606_v20, %v1596_v2  ;;  %v1062_v25 = vor.u32 8388608, %v3965_v63  ;;  %v4029_v9 = vsub.s32 32, %v1068_v14  ;;  %v1074_v59 = vshll.u32 %v2869_v28, %v1068_v14 }
 0x150   : > { %v1339_v48 = vmul.f32 %v1338_v23, %v1336_v38  ;;  %v1346_v40 = vmul.f32 %v1345_v55, %v1336_v38  ;;  %v1609_v44 = vmul.u32 %v3894_v56, %v1555_v21  ;;  %v4033_v49 = vshrl.u32 %v1066_v35, 5 }
 0x151   : > { %v1608_v29 = vadd.s32 %v1607_v17, %v1598_v13  ;;  %vm1611_vm8 = vc.u32 %v4026_v30, %v4020_v1  ;;  %v1071_v5 = vshll.u32 %v2868_v26, %v1068_v14  ;;  %v1075_v10 = vshrl.u32 %v2870_v31, %v4029_v9 }
 0x152   : > { %v1340_v63 = vadd.f32 -0.4999988, %v1339_v48  ;;  %v1347_v50 = vadd.f32 -0.16666654, %v1346_v40  ;;  %vm1353_vm9 = vcmp.lt.s32.totalorder %v1352_v6, 2  ;;  %v1077_v45 = vshll.u32 %v2870_v31, %v1068_v14 }
 0x153   : > { %v1078_v52 = vshrl.u32 %v2867_v22, %v4029_v9  ;;  %vm1351_vm10 = vweird.f32 %v3595_v11  ;;  %v1612_v56 = vadd.s32 1, %v1608_v29  ;;  %v1072_v51 = vshrl.u32 %v2869_v28, %v4029_v9 }
 0x154   : > { %v4046_v15 = vor.u32 %v1075_v10, %v1074_v59  ;;  %v1080_v46 = vshll.u32 %v2867_v22, %v1068_v14  ;;  %v1341_v0 = vmul.f32 %v1340_v63, %v1336_v38  ;;  %v1348_v58 = vmul.f32 %v1347_v50, %v1336_v38  ;;  %v2166_v63 = vld [vmem:[%s3352_s1 + $0x10] sm:$0xff] }
 0x155   : > { %v4049_v7 = vor.u32 %v1078_v52, %v1077_v45  ;;  %v1081_v31 = vshrl.u32 %v2871_v37, %v4029_v9  ;;  %v1613_v47 = vsel %vm1611_vm8, %v1612_v56, %v1608_v29  ;;  %v1083_v33 = vshll.u32 %v2871_v37, %v1068_v14 }
 0x156   : > { %v1084_v28 = vshrl.u32 %v2872_v42, %v4029_v9  ;;  %vm1089_vm11 = vcmp.lt.s32.totalorder %v4033_v49, 4  ;;  %v1342_v19 = vadd.f32 1.0, %v1341_v0  ;;  %v1349_v22 = vadd.f32 1.0, %v1348_v58 }
 0x157   : > { %v1614_v61 = vadd.s32 %v1613_v47, %v1609_v44  ;;  %v1082_v4 = vor.u32 %v1081_v31, %v1080_v46  ;;  %vm1357_vm12 = vcmp.eq.s32.totalorder %v1352_v6, 2  ;;  %v4060_v38 = vor.u32 %v1072_v51, %v1071_v5 }
 0x158   : > { %v1085_v8 = vor.u32 %v1084_v28, %v1083_v33  ;;  %vm1086_vm13 = vcmp.lt.s32.totalorder %v4033_v49, 1  ;;  %v1350_v39 = vmul.f32 %v1349_v22, %v4007_v60  ;;  %v1358_v35 = vxor.u32 2147483648, %v1342_v19 }
 0x159   : > { %v1615_v21 = vadd.s32 536870912, %v1614_v61  ;;  %vm1088_vm0 = vcmp.lt.s32.totalorder %v4033_v49, 3  ;;  %vm1354_vm14 = vcmp.eq.s32.totalorder %v1352_v6, 0  ;;  %vm1087_vm15 = vcmp.lt.s32.totalorder %v4033_v49, 2 }
 0x15a   : > { %v1095_v37 = vsel %vm1089_vm11, %v1082_v4, 920167782  ;;  %v1099_v42 = vsel %vm1089_vm11, %v1085_v8, 1326507024  ;;  %v1355_v2 = vxor.u32 2147483648, %v1350_v39  ;;  %v1359_v3 = vsel %vm1357_vm12, %v1358_v35, %v1350_v39 }
 0x15b   : > { %v4070_v16 = vshrl.u32 %v1615_v21, 30  ;;  %v1098_v60 = vsel %vm1086_vm13, %v4046_v15, %v4049_v7  ;;  %v1094_v36 = vsel %vm1086_vm13, %v4060_v38, %v4046_v15  ;;  %v1096_v54 = vsel %vm1088_vm0, %v4049_v7, %v1095_v37 }
 0x15c   : > { %v1100_v41 = vsel %vm1088_vm0, %v1082_v4, %v1099_v42  ;;  %v4085_v13 = vshll.u32 %v1062_v25, 8  ;;  %v1356_v20 = vsel %vm1354_vm14, %v1342_v19, %v1355_v2  ;;  %2783 = vpow2.f32 %v3879_v57  ;;  %v2802_v57 = vld [vmem:[%s3031_s26 + $0x10] sm:$0xff]  ;;  %s547_s26 = sand.u32 1, %s2857_s19  }
 0x15d   : > { %v1617_v14 = vshll.u32 %v4070_v16, 30  ;;  %v1360_v23 = vsel %vm1353_vm9, %v1356_v20, %v1359_v3  ;;  %v1101_v55 = vsel %vm1087_vm15, %v1098_v60, %v1100_v41  ;;  %v1097_v48 = vsel %vm1087_vm15, %v1094_v36, %v1096_v54  ;;  %s2622_s30 = sshll.u32 %s547_s26, 3  ;;  %s2496_s2 = scalar_lea.sflag [#allocation3], %s547_s26 }
 0x15e   : > { %v1361_v17 = vsel %vm1351_vm10, nan, %v1360_v23  ;;  %v1103_v25 = vand.u32 65535, %v4085_v13  ;;  %v1104_v44 = vshrl.u32 %v4085_v13, 16  ;;  %v1105_v29 = vand.u32 65535, %v1101_v55  ;;  %s549_s16 = scalar_lea.vmem [#allocation2], %s2622_s30 }
 0x15f   : > { %v1618_v59 = vsub.s32 %v1614_v61, %v1617_v14  ;;  %v2134_v40 = vadd.f32 1.0, %v1361_v17  ;;  %vm2150_vm1 = vcmp.lt.f32.partialorder %v2802_v57, 5.0  ;;  %v1106_v5 = vshrl.u32 %v1101_v55, 16  ;;  %s2508_s20 = sshll.u32 %s549_s16, 4  ;;  %s2509_s20 = int_to_ptr.vmem [resolvable:$true] %s2508_s20 }
 0x160   : > { %v1128_v50 = vshrl.u32 %v1097_v48, 16  ;;  %v1107_v45 = vmul.u32 %v1105_v29, %v1103_v25  ;;  %v1127_v56 = vand.u32 65535, %v1097_v48  ;;  %v4100_v58 = vmul.u32 %v1105_v29, %v1104_v44 }
 0x161   : > { %vm1619_vm3 = vcmp.lt.s32.totalorder %v1618_v59, 0  ;;  %v1620_v6 = vsub.s32 0, %v1618_v59  ;;  %v2142_v10 = vmul.f32 0.5, %v2134_v40  ;;  %v1108_v52 = vmul.u32 %v1106_v5, %v1103_v25 }
 0x162   : > { %v2784_v51 = vpop.eup %2783  ;;  %v1610_v33 = vadd.s32 %v4020_v1, %v4026_v30  ;;  %v4104_v19 = vmul.u32 %v1128_v50, %v1103_v25  ;;  %v1070_v22 = vshrl.u32 %v2868_v26, %v4029_v9  ;;  %v1110_v61 = vmul.u32 %v1106_v5, %v1104_v44 }
 0x163   : > { %v1621_v11 = vsel %vm1619_vm3, %v1620_v6, %v1618_v59  ;;  %v2158_v46 = vsel %vm2150_vm1, %v2142_v10, 0.0  ;;  %v1111_v47 = vshll.u32 %v1108_v52, 16  ;;  %v1129_v4 = vmul.u32 %v1127_v56, %v1103_v25 }
 0x164   : > { %v1622_v0 = vclz %v1621_v11  ;;  %v2174_v31 = vmul.f32 %v2166_v63, %v2158_v46  ;;  %v759_v8 = vadd.f32 1.0, %v2784_v51  ;;  %v1113_v39 = vshll.u32 %v4100_v58, 16 }
 0x165   : > { %vm1115_vm4 = vc.u32 %v1107_v45, %v1111_v47  ;;  %v1131_v35 = vmul.u32 %v1127_v56, %v1104_v44  ;;  %v762_v37 = vmul.f32 -0.5, %v2784_v51  ;;  %v1117_v1 = vadd.s32 %v1111_v47, %v1107_v45 }
 0x166   : > { %v2669_v28 = vadd.s32 4294967294, %v1622_v0  ;;  %2192 = vperm.xlu1 %2757, %v2174_v31   ;;  %v1116_v42 = vsel %vm1115_vm4, 1, %v2873_v12  ;;  %v1133_v60 = vshll.u32 %v4104_v19, 16  ;;  %v663_v26 = vmax.f32 %v3837_v43, 0.0 }
 0x167   : > { %2785 = vlog2.f32 %v759_v8  ;;  %v1090_v9 = vsel %vm1086_vm13, %v1070_v22, %v4060_v38  ;;  %v1091_v36 = vsel %vm1089_vm11, %v4049_v7, 2102212464  ;;  %v1118_v20 = vadd.s32 %v1116_v42, %v1110_v61 }
 0x168   : > { %vm2670_vm5 = vcmp.lt.s32.totalorder %v2669_v28, 0  ;;  %v1132_v14 = vmul.u32 %v1128_v50, %v1104_v44  ;;  %v763_v23 = vadd.f32 1.0, %v762_v37  ;;  %v1112_v55 = vshrl.u32 %v1108_v52, 16 }
 0x169   : > { %v1625_v21 = vsel %vm2670_vm5, 0, %v2669_v28  ;;  %vm1119_vm6 = vc.u32 %v1117_v1, %v1113_v39  ;;  %v1135_v17 = vshll.u32 %v1131_v35, 16  ;;  %vm1137_vm7 = vc.u32 %v1129_v4, %v1133_v60 }
 0x16a   : > { %v1626_v30 = vsub.s32 32, %v1625_v21  ;;  %v1627_v2 = vshll.u32 %v1618_v59, %v1625_v21  ;;  %v1630_v3 = vsub.s32 4294967266, %v1625_v21  ;;  %v652_v59 = vpop.f32.mrf.mxu0  ;;  %v1120_v40 = vsel %vm1119_vm6, 1, %v2873_v12 }
 0x16b   : > { %v765_v29 = vand.u32 2147483647, %v2784_v51  ;;  %v1122_v38 = vadd.s32 %v1120_v40, %v1118_v20  ;;  %v1138_v57 = vsel %vm1137_vm7, 1, %v2873_v12  ;;  %v1139_v6 = vadd.s32 %v1133_v60, %v1129_v4 }
 0x16c   : > { %v1628_v54 = vshrl.u32 %v1610_v33, %v1626_v30  ;;  %v1631_v41 = vadd.s32 127, %v1630_v3  ;;  %v1114_v10 = vshrl.u32 %v4100_v58, 16  ;;  %v1140_v44 = vadd.s32 %v1138_v57, %v1132_v14 }
 0x16d   : > { %v2786_v63 = vpop.eup %2785  ;;  %v1092_v50 = vsel %vm1088_vm0, %v4046_v15, %v1091_v36  ;;  %v1123_v11 = vadd.s32 %v1122_v38, %v1112_v55  ;;  %v1134_v45 = vshrl.u32 %v4104_v19, 16  ;;  %vm1141_vm8 = vc.u32 %v1139_v6, %v1135_v17 }
 0x16e   : > { %v1629_v48 = vor.u32 %v1628_v54, %v1627_v2  ;;  %v1632_v25 = vshll.u32 %v1631_v41, 23  ;;  %v761_v56 = vmul.f32 0.6931472, %v2786_v63  ;;  %v764_v46 = vmul.f32 %v2784_v51, %v763_v23 }
 0x16f   : > { %v1142_v0 = vsel %vm1141_vm8, 1, %v2873_v12  ;;  %v4127_v31 = vadd.f32 %v3790_v24, %v652_v59  ;;  %vm766_vm9 = vcmp.lt.f32.partialorder %v765_v29, 0.0004427343  ;;  %v1136_v58 = vshrl.u32 %v1131_v35, 16 }
 0x170   : > { %v1633_v7 = vor.u32 4788187, %v1632_v25  ;;  %v1636_v5 = vcvt.s32.f32 %v1629_v48  ;;  %v1144_v47 = vadd.s32 %v1142_v0, %v1140_v44  ;;  %v767_v28 = vsel %vm766_vm9, %v764_v46, %v761_v56 }
 0x171   : > { %v4129_v22 = vadd.s32 %v1123_v11, %v1114_v10  ;;  %v4131_v15 = vadd.s32 %v1139_v6, %v1135_v17  ;;  %vm1518_vm10 = vcmp.lt.s32.totalorder %v3823_v18, 0  ;;  %v791_v19 = vadd.f32 %v767_v28, %v663_v26 }
 0x172   : > { %v1634_v52 = vand.u32 2147483647, %v1633_v7  ;;  %v1093_v51 = vsel %vm1087_vm15, %v1090_v9, %v1092_v50  ;;  %v1145_v61 = vadd.s32 %v1144_v47, %v1134_v45  ;;  %vm4138_vm11 = vcmp.le.f32.partialorder %v1516_v53, 0.7853982  ;;  %v655_v35 = vpop.f32.mrf.mxu0 }
 0x173   : > { %vm671_vm12 = vcmp.ne.f32.partialorder %v3837_v43, %v3837_v43  ;;  %v1147_v37 = vmul.u32 %v4085_v13, %v1093_v51  ;;  %vm1149_vm13 = vc.u32 %v4129_v22, %v4131_v15  ;;  %v688_v53 = vand.u32 2147483647, %v4127_v31 }
 0x174   : > { %v1637_v33 = vmul.f32 %v1636_v5, %v1634_v52  ;;  %v799_v8 = vsel %vm671_vm12, %v3837_v43, %v791_v19  ;;  %v1146_v39 = vadd.s32 %v1145_v61, %v1136_v58  ;;  %v1640_v42 = vsub.s32 4, %v4070_v16 }
 0x175   : > { %v2645_v49 = vadd.f32 -0.6931472, %v799_v8  ;;  %v4157_v2 = vadd.f32 %v3790_v24, %v655_v35  ;;  %v696_v9 = vsub.f32 0.0, %v688_v53  ;;  %vm1659_vm3 = vweird.f32 %v3823_v18  ;;  %v2168_v35 = vld [vmem:[%s3352_s1 + $0x20] sm:$0xff] }
 0x176   : > { %v1638_v4 = vxor.u32 2147483648, %v1637_v33  ;;  %v1150_v43 = vadd.s32 1, %v1146_v39  ;;  %v1641_v36 = vsel %vm1518_vm10, %v1640_v42, %v4070_v16  ;;  %vm2152_vm5 = vcmp.lt.f32.partialorder %v3813_v32, 5.0 }
 0x177   : > { %2653 = vmatmul.msk.f32.gmra.mxu1 %vm818_vm2, %v2645_v49  ;;  %v689_v14 = vand.u32 2147483647, %v4157_v2  ;;  %v1643_v23 = vsel %vm4138_vm11, 0, %v1641_v36  ;;  %v710_v59 = vmul.f32 1.442695, %v696_v9  ;;  %vm1056_vm8 = vcmp.lt.s32.totalorder %v3871_v62, 0 }
 0x178   : > { %v1639_v21 = vsel %vm1518_vm10, %v1638_v4, %v1637_v33  ;;  %v1151_v3 = vsel %vm1149_vm13, %v1150_v43, %v1146_v39  ;;  %v1660_v29 = vand.u32 3, %v1643_v23  ;;  %v1148_v33 = vadd.s32 %v4131_v15, %v4129_v22 }
 0x179   : > { %v1642_v1 = vsel %vm4138_vm11, %v3823_v18, %v1639_v21  ;;  %v1152_v26 = vadd.s32 %v1151_v3, %v1147_v37  ;;  %v697_v38 = vsub.f32 0.0, %v689_v14  ;;  %2787 = vpow2.f32 %v710_v59  ;;  %v2280_v14 = vpop.permute.xlu2 %2279 }
 0x17a   : > { %v1644_v30 = vmul.f32 %v1642_v1, %v1642_v1  ;;  %vm1665_vm14 = vcmp.eq.s32.totalorder %v1660_v29, 2  ;;  %vm1662_vm15 = vcmp.eq.s32.totalorder %v1660_v29, 0  ;;  %vm1661_vm1 = vcmp.lt.s32.totalorder %v1660_v29, 2 }
 0x17b   : > { %v1153_v20 = vadd.s32 536870912, %v1152_v26  ;;  %v712_v44 = vmul.f32 1.442695, %v697_v38  ;;  %vm4176_vm7 = vcmp.le.f32.partialorder %v1054_v27, 0.7853982  ;;  %vm672_vm9 = vcmp.ne.f32.partialorder %v4127_v31, %v4127_v31  ;;  %v2231_v27 = vld [vmem:[%s4312_s10 + $0x10] sm:$0xff] }
 0x17c   : > { %v1645_v13 = vmul.f32 -0.001358992, %v1644_v30  ;;  %v1652_v60 = vmul.f32 -0.00019511016, %v1644_v30  ;;  %vm673_vm11 = vcmp.ne.f32.partialorder %v4157_v2, %v4157_v2 }
 0x17d   : > { %v4165_v17 = vshrl.u32 %v1153_v20, 30  ;;  %2789 = vpow2.f32 %v712_v44  ;;  %v2229_v44 = vld [vmem:[%s4312_s10] sm:$0xff] }
 0x17e   : > { %v1646_v54 = vadd.f32 0.041655596, %v1645_v13  ;;  %v1653_v41 = vadd.f32 0.008332121, %v1652_v60 }
 0x17f   : > { %v1155_v40 = vshll.u32 %v4165_v17, 30  ;;  %v2788_v46 = vpop.eup %2787 }
 0x180   : > { %v1647_v55 = vmul.f32 %v1646_v54, %v1644_v30  ;;  %v1654_v24 = vmul.f32 %v1653_v41, %v1644_v30  ;;  %v768_v51 = vadd.f32 1.0, %v2788_v46  ;;  %v771_v61 = vmul.f32 -0.5, %v2788_v46 }
 0x181   : > { %v1156_v6 = vsub.s32 %v1152_v26, %v1155_v40  ;;  %v774_v43 = vand.u32 2147483647, %v2788_v46  ;;  %v664_v54 = vmax.f32 %v4127_v31, 0.0 }
 0x182   : > { %v1648_v48 = vadd.f32 -0.4999988, %v1647_v55  ;;  %v1655_v25 = vadd.f32 -0.16666654, %v1654_v24  ;;  %2791 = vlog2.f32 %v768_v51  ;;  %v772_v15 = vadd.f32 1.0, %v771_v61 }
 0x183   : > { %vm1157_vm0 = vcmp.lt.s32.totalorder %v1156_v6, 0  ;;  %v1158_v10 = vsub.s32 0, %v1156_v6  ;;  %v2790_v37 = vpop.eup %2789  ;;  %vm775_vm6 = vcmp.lt.f32.partialorder %v774_v43, 0.0004427343 }
 0x184   : > { %v1649_v16 = vmul.f32 %v1648_v48, %v1644_v30  ;;  %v1656_v57 = vmul.f32 %v1655_v25, %v1644_v30  ;;  %v777_v13 = vadd.f32 1.0, %v2790_v37  ;;  %v780_v26 = vmul.f32 -0.5, %v2790_v37  ;;  %v2232_v48 = vld [vmem:[%s4312_s10 + $0x18] sm:$0xff] }
 0x185   : > { %v1159_v11 = vsel %vm1157_vm0, %v1158_v10, %v1156_v6  ;;  %v773_v36 = vmul.f32 %v2788_v46, %v772_v15  ;;  %v783_v59 = vand.u32 2147483647, %v2790_v37  ;;  %2248 = vmatpush.msrb.mxu2 %v2232_v48  ;;  %v2165_v15 = vld [vmem:[%s3352_s1 + $0x8] sm:$0xff] }
 0x186   : > { %v1650_v7 = vadd.f32 1.0, %v1649_v16  ;;  %v1657_v5 = vadd.f32 1.0, %v1656_v57  ;;  %v1160_v45 = vclz %v1159_v11  ;;  %2793 = vlog2.f32 %v777_v13  ;;  %v2230_v16 = vld [vmem:[%s4312_s10 + $0x8] sm:$0xff] }
 0x187   : > { %v781_v55 = vadd.f32 1.0, %v780_v26  ;;  %v1178_v57 = vsub.s32 4, %v4165_v17  ;;  %2249 = vmatpush.msrb.mxu2 %v2231_v27  ;;  %vm784_vm10 = vcmp.lt.f32.partialorder %v783_v59, 0.0004427343  ;;  %v2874_v26 = vmov 0.0  }
 0x188   : > { %v1658_v63 = vmul.f32 %v1657_v5, %v1642_v1  ;;  %v1666_v50 = vxor.u32 2147483648, %v1650_v7  ;;  %v2660_v0 = vadd.s32 4294967294, %v1160_v45  ;;  %v2792_v60 = vpop.eup %2791  ;;  %v665_v5 = vmax.f32 %v4157_v2, 0.0 }
 0x189   : > { %v770_v32 = vmul.f32 0.6931472, %v2792_v60  ;;  %2250 = vmatpush.msrb.mxu2 %v2230_v16  ;;  %v2268_v60 = vpop.permute.xlu0 %2267 }
 0x18a   : > { %v1663_v52 = vxor.u32 2147483648, %v1658_v63  ;;  %v1667_v56 = vsel %vm1665_vm14, %v1666_v50, %v1658_v63  ;;  %vm2661_vm4 = vcmp.lt.s32.totalorder %v2660_v0, 0  ;;  %vm1197_vm14 = vweird.f32 %v3871_v62 }
 0x18b   : > { %v1163_v19 = vsel %vm2661_vm4, 0, %v2660_v0  ;;  %v776_v20 = vsel %vm775_vm6, %v773_v36, %v770_v32  ;;  %2251 = vmatpush.msrb.mxu2 %v2229_v44  ;;  %v2274_v36 = vpop.permute.xlu1 %2273 }
 0x18c   : > { %v1664_v58 = vsel %vm1662_vm15, %v1650_v7, %v1663_v52  ;;  %v1164_v4 = vsub.s32 32, %v1163_v19  ;;  %v1165_v8 = vshll.u32 %v1156_v6, %v1163_v19  ;;  %v1168_v39 = vsub.s32 4294967266, %v1163_v19  ;;  %v2794_v40 = vpop.eup %2793 }
 0x18d   : > { %v1668_v47 = vsel %vm1661_vm1, %v1664_v58, %v1667_v56  ;;  %v792_v23 = vadd.f32 %v776_v20, %v664_v54  ;;  %v782_v7 = vmul.f32 %v2790_v37, %v781_v55  ;;  %v1179_v52 = vsel %vm1056_vm8, %v1178_v57, %v4165_v17  ;;  %v2283_v55 = vpop.permute.xlu2 %2282 }
 0x18e   : > { %v1669_v28 = vsel %vm1659_vm3, nan, %v1668_v47  ;;  %v1166_v21 = vshrl.u32 %v1148_v33, %v1164_v4  ;;  %v1169_v49 = vadd.s32 127, %v1168_v39  ;;  %v1181_v47 = vsel %vm4176_vm7, 0, %v1179_v52  ;;  %v2760_v52 = vld [vmem:[%s4311_s9] ss:$0 sm:$0xff] }
 0x18f   : > { %v2136_v12 = vadd.f32 1.0, %v1669_v28  ;;  %v800_v25 = vsel %vm672_vm9, %v4127_v31, %v792_v23  ;;  %v779_v31 = vmul.f32 0.6931472, %v2794_v40  ;;  %v1198_v17 = vand.u32 3, %v1181_v47  ;;  %v860_v40 = vpop.f32.mrf.mxu1 }
 0x190   : > { %v1167_v42 = vor.u32 %v1166_v21, %v1165_v8  ;;  %v1170_v22 = vshll.u32 %v1169_v49, 23  ;;  %v2646_v38 = vadd.f32 -0.6931472, %v800_v25  ;;  %v2228_v8 = vld [vmem:[%s553_s23] sm:$0xff]  ;;  %vm2149_vm15 = vcmp.lt.f32.partialorder %v3857_v34, 5.0  ;;  %s2506_s23 = scalar_lea.hbm %s4317_s15, %s3010_s25 }
 0x191   : > { %v2144_v18 = vmul.f32 0.5, %v2136_v12  ;;  %v785_v63 = vsel %vm784_vm10, %v782_v7, %v779_v31  ;;  %vm1203_vm12 = vcmp.eq.s32.totalorder %v1198_v17, 2  ;;  %vm1200_vm13 = vcmp.eq.s32.totalorder %v1198_v17, 0  ;;  %v2271_v32 = vpop.permute.xlu0 %2270  ;;  %s2510_s0 = sshll.u32 %s2506_s23, 4  ;;  %s2511_s0 = int_to_ptr.hbm [resolvable:$true] %s2510_s0 }
 0x192   : > { %v1171_v30 = vor.u32 4788187, %v1170_v22  ;;  %v1174_v3 = vcvt.s32.f32 %v1167_v42  ;;  %2654 = vmatmul.msk.f32.gmra.mxu1 %vm818_vm2, %v2646_v38  ;;  %v793_v45 = vadd.f32 %v785_v63, %v665_v5  ;;  %vm1199_vm0 = vcmp.lt.s32.totalorder %v1198_v17, 2  ;;  %s2817_s3 = sshra.s32 %s2511_s0, 4  ;;  %s2818_s3 = int_to_ptr.hbm [resolvable:$true] %s2817_s3 }
 0x193   : > { %v2160_v53 = vsel %vm2152_vm5, %v2144_v18, 0.0  ;;  %vm2314_vm3 = vcmask 64512   ;;  %s2819_s4 = scalar_lea.hbm %s2818_s3, 8  ;;  %p2824_p1 = scmp.lt.s32.totalorder %s2818_s3, %s4317_s15 }
 0x194   : > { %v2176_v1 = vmul.f32 %v2168_v35, %v2160_v53  ;;  %v1172_v9 = vand.u32 2147483647, %v1171_v30  ;;  %v801_v0 = vsel %vm673_vm11, %v4157_v2, %v793_v45  ;;  %v2264_v30 = vlaneseq  ;;  %p2820_p12 = scmp.ne.s32.totalorder %s2818_s3, %s2819_s4  ;;  %p2825_p2 = scmp.lt.s32.totalorder %s2823_s17, %s2819_s4 }
 0x195   : > { %v2647_v58 = vadd.f32 -0.6931472, %v801_v0  ;;  %vm2389_vm11 = vcmask 523264  }
 0x196   : > { %2202 = vperm.xlu2 %2758, %v2176_v1   ;;  %v1175_v41 = vmul.f32 %v1174_v3, %v1172_v9  ;;  %v2265_v3 = vand.u32 127, %v2264_v30  ;;  %p2821_p13 = pnand %p2820_p12, %p2993_p5  ;;  %p2826_p3 = por %p2825_p2, %p2824_p1 }
 0x197   : > { %2655 = vmatmul.msk.f32.vlgmr.msra.gmra.mxu2 %vm818_vm2, %v2647_v58 }
 0x198   : > { %v1176_v24 = vxor.u32 2147483648, %v1175_v41  ;;  %vm2290_vm1 = vcmp.eq.s32.totalorder %v2268_v60, %v2265_v3  ;;  %vm2291_vm4 = vcmp.eq.s32.totalorder %v2271_v32, %v2265_v3  ;;  %vm2292_vm5 = vcmp.eq.s32.totalorder %v2274_v36, %v2265_v3  ;;  %v2415_v32 = vld [vmem:[%s4313_s11 + $0x10] sm:$0xff]  ;;  %v2413_v36 = vld [vmem:[%s4313_s11] sm:$0xff]  ;;  %p2822_p0 = pneg %p2821_p13 }
 0x199   : > { %v2681_v9 = vsel %vm2290_vm1, 1.0, %v2874_v26  ;;  %v2682_v34 = vsel %vm2291_vm4, 1.0, %v2874_v26  ;;  %v2683_v54 = vsel %vm2292_vm5, 1.0, %v2874_v26  ;;  %v2286_v59 = vpop.permute.xlu0 %2285 }
 0x19a   : > { %v1177_v29 = vsel %vm1056_vm8, %v1176_v24, %v1175_v41  ;;  %v2277_v41 = vpop.permute.xlu1 %2276  ;;  %vm2295_vm8 = vcmp.eq.s32.totalorder %v2283_v55, %v2265_v3  ;;  %vm2296_vm9 = vcmp.eq.s32.totalorder %v2286_v59, %v2265_v3  ;;  %p2827_p4 = pnand %p2826_p3, %p2822_p0 }
 0x19b   : > { %v1180_v6 = vsel %vm4176_vm7, %v3871_v62, %v1177_v29  ;;  %vm2293_vm6 = vcmp.eq.s32.totalorder %v2277_v41, %v2265_v3  ;;  %vm2294_vm7 = vcmp.eq.s32.totalorder %v2280_v14, %v2265_v3  ;;  %v2686_v24 = vsel %vm2295_vm8, 1.0, %v2874_v26  ;;  %v863_v29 = vpop.f32.mrf.mxu1  ;;  %v2761_v41 = vld [vmem:[%s4314_s12] ss:$0 sm:$0xff]  ;;  %v2465_v14 = vld [vmem:[%s4315_s13 + $0x10] sm:$0xff] }
 0x19c   : > { %v1182_v10 = vmul.f32 %v1180_v6, %v1180_v6  ;;  %v2684_v20 = vsel %vm2293_vm6, 1.0, %v2874_v26  ;;  %v2685_v23 = vsel %vm2294_vm7, 1.0, %v2874_v26  ;;  %v2687_v48 = vsel %vm2296_vm9, 1.0, %v2874_v26 }
 0x19e   : > { %v1183_v50 = vmul.f32 -0.001358992, %v1182_v10  ;;  %v1190_v11 = vmul.f32 -0.00019511016, %v1182_v10 }
 0x19f   : > { %2680 = vmatmul.msk.f32.vlgmr.msrb.gmra.mxu2 %vm818_vm2, %v2228_v8 }
 0x1a0   : > { %v1184_v56 = vadd.f32 0.041655596, %v1183_v50  ;;  %v1191_v46 = vadd.f32 0.008332121, %v1190_v11  ;;  %v2218_v50 = vpop.permute.xlu2 %2217 }
 0x1a1   : > { %v2213_v11 = vpop.permute.xlu0 %2212 }
 0x1a2   : > { %v1185_v33 = vmul.f32 %v1184_v56, %v1182_v10  ;;  %v1192_v28 = vmul.f32 %v1191_v46, %v1182_v10  ;;  %v2289_v27 = vpop.permute.xlu1 %2288 }
 0x1a3   : > { %vm2297_vm10 = vcmp.eq.s32.totalorder %v2289_v27, %v2265_v3  ;;  %v866_v57 = vpop.f32.mrf.mxu1 }
 0x1a4   : > { %v1186_v19 = vadd.f32 -0.4999988, %v1185_v33  ;;  %v1193_v51 = vadd.f32 -0.16666654, %v1192_v28  ;;  %v2688_v25 = vsel %vm2297_vm10, 1.0, %v2874_v26 }
 0x1a6   : > { %v1187_v61 = vmul.f32 %v1186_v19, %v1182_v10  ;;  %v1194_v12 = vmul.f32 %v1193_v51, %v1182_v10 }
 0x1a8   : > { %v1188_v4 = vadd.f32 1.0, %v1187_v61  ;;  %v1195_v2 = vadd.f32 1.0, %v1194_v12 }
 0x1a9   : > { %v2198_v19 = vpop.permute.xlu0 %2197 }
 0x1aa   : > { %v1196_v39 = vmul.f32 %v1195_v2, %v1180_v6  ;;  %v1204_v18 = vxor.u32 2147483648, %v1188_v4  ;;  %v2208_v0 = vpop.permute.xlu1 %2207 }
 0x1ab   : > { %v869_v31 = vpop.f32.mrf.mxu1 }
 0x1ac   : > { %v1201_v35 = vxor.u32 2147483648, %v1196_v39  ;;  %v1205_v21 = vsel %vm1203_vm12, %v1204_v18, %v1196_v39  ;;  %v867_v39 = vadd.f32 %v2760_v52, %v866_v57 }
 0x1ae   : > { %v1202_v49 = vsel %vm1200_vm13, %v1188_v4, %v1201_v35  ;;  %v870_v4 = vadd.f32 %v2760_v52, %v869_v31 }
 0x1af   : > { %v1206_v37 = vsel %vm1199_vm0, %v1202_v49, %v1205_v21  ;;  %v864_v49 = vadd.f32 %v2760_v52, %v863_v29 }
 0x1b0   : > { %v1207_v53 = vsel %vm1197_vm14, nan, %v1206_v37  ;;  %v2223_v37 = vmul.f32 %v2198_v19, %v870_v4 }
 0x1b1   : > { %v2133_v42 = vadd.f32 1.0, %v1207_v53 }
 0x1b3   : > { %v2141_v22 = vmul.f32 0.5, %v2133_v42 }
 0x1b5   : > { %v2157_v1 = vsel %vm2149_vm15, %v2141_v22, 0.0  ;;  %v861_v22 = vadd.f32 %v2760_v52, %v860_v40 }
 0x1b6   : > { %v2173_v43 = vmul.f32 %v2165_v15, %v2157_v1 }
 0x1b8   : > { %2187 = vperm.xlu2 %2758, %v2173_v43   ;;  %v2183_v43 = vpop.permute.xlu0 %2182 }
 0x1c7   : > { %v872_v5 = vpop.f32.mrf.mxu1 }
 0x1c8   : > { %v873_v17 = vadd.f32 %v2760_v52, %v872_v5 }
 0x1d8   : > { %v2193_v21 = vpop.permute.xlu1 %2192 }
 0x1d9   : > { %v2222_v15 = vmul.f32 %v2193_v21, %v867_v39 }
 0x1f0   : > { %v2203_v47 = vpop.permute.xlu2 %2202 }
 0x1f1   : > { %v2224_v18 = vmul.f32 %v2203_v47, %v873_v17 }
 0x1f4   : > { %v875_v44 = vpop.f32.mrf.mxu1 }
 0x1f5   : > { %v876_v33 = vadd.f32 %v2760_v52, %v875_v44 }
 0x1f7   : > { %v2225_v2 = vmul.f32 %v2208_v0, %v876_v33 }
 0x20f   : > { %v878_v56 = vpop.f32.mrf.mxu1 }
 0x210   : > { %v879_v58 = vadd.f32 %v2760_v52, %v878_v56 }
 0x212   : > { %v2226_v61 = vmul.f32 %v2213_v11, %v879_v58  ;;  %v2188_v42 = vpop.permute.xlu2 %2187  ;;  %v2762_v11 = vld [vmem:[%s4316_s14] ss:$0 sm:$0xff] }
 0x213   : > { %v2221_v30 = vmul.f32 %v2188_v42, %v864_v49 }
 0x21a   : > { %v881_v13 = vpop.f32.mrf.mxu2 }
 0x21b   : > { %v882_v46 = vadd.f32 %v2760_v52, %v881_v13  ;;  %v2220_v13 = vmul.f32 %v2183_v43, %v861_v22 }
 0x21d   : > { %v2227_v28 = vmul.f32 %v2218_v50, %v882_v46 }
 0x222   : > { %v2253_v62 = vpop.f32.mrf.mxu2 }
 0x223   : > { %2354 = vmatpush.msra.mxu3 %v2253_v62  ;;  %v2416_v62 = vld [vmem:[%s4313_s11 + $0x18] sm:$0xff] }
 0x224   : > { %2689 = vmatmul.msk.f32.vlgmr.msra.gmra.mxu3 %vm2314_vm3, %v2681_v9  ;;  %v2388_v9 = vld [vmem:[%s4307_s5] sm:$0xff] }
 0x22c   : > { %2690 = vmatmul.msk.f32.gmra.mxu3 %vm2314_vm3, %v2682_v34  ;;  %v2414_v34 = vld [vmem:[%s4313_s11 + $0x8] sm:$0xff] }
 0x234   : > { %2691 = vmatmul.msk.f32.gmra.mxu3 %vm2314_vm3, %v2683_v54 }
 0x23c   : > { %2692 = vmatmul.msk.f32.gmra.mxu3 %vm2314_vm3, %v2684_v20  ;;  %v2466_v20 = vld [vmem:[%s4315_s13 + $0x18] sm:$0xff] }
 0x244   : > { %2693 = vmatmul.msk.f32.gmra.mxu3 %vm2314_vm3, %v2685_v23 }
 0x24c   : > { %2694 = vmatmul.msk.f32.gmra.mxu3 %vm2314_vm3, %v2686_v24  ;;  %v2464_v24 = vld [vmem:[%s4315_s13 + $0x8] sm:$0xff] }
 0x254   : > { %2695 = vmatmul.msk.f32.gmra.mxu3 %vm2314_vm3, %v2687_v48  ;;  %v2463_v48 = vld [vmem:[%s4315_s13] sm:$0xff] }
 0x25c   : > { %2696 = vmatmul.msk.f32.gmra.mxu3 %vm2314_vm3, %v2688_v25 }
 0x2a7   : > { %v2356_v38 = vpop.f32.mrf.mxu3 }
 0x2a8   : > { %v2380_v26 = vmul.f32 %v2356_v38, %v2220_v13 }
 0x2af   : > { %v2359_v16 = vpop.f32.mrf.mxu3 }
 0x2b0   : > { %v2381_v60 = vmul.f32 %v2359_v16, %v2221_v30 }
 0x2b7   : > { %v2362_v6 = vpop.f32.mrf.mxu3 }
 0x2b8   : > { %v2382_v3 = vmul.f32 %v2362_v6, %v2222_v15 }
 0x2bf   : > { %v2365_v7 = vpop.f32.mrf.mxu3 }
 0x2c0   : > { %v2383_v1 = vmul.f32 %v2365_v7, %v2223_v37 }
 0x2c7   : > { %v2368_v10 = vpop.f32.mrf.mxu3 }
 0x2c8   : > { %v2384_v53 = vmul.f32 %v2368_v10, %v2224_v18 }
 0x2cf   : > { %v2371_v63 = vpop.f32.mrf.mxu3 }
 0x2d0   : > { %v2385_v35 = vmul.f32 %v2371_v63, %v2225_v2 }
 0x2d7   : > { %v2374_v45 = vpop.f32.mrf.mxu3 }
 0x2d8   : > { %v2386_v8 = vmul.f32 %v2374_v45, %v2226_v61 }
 0x2df   : > { %v2377_v51 = vpop.f32.mrf.mxu3 }
 0x2e0   : > { %v2387_v12 = vmul.f32 %v2377_v51, %v2227_v28 }
 0x2e2   : > { %2401 = vmatpush.msra.mxu2 %v2387_v12 }
 0x2e4   : > { %2402 = vmatpush.msra.mxu2 %v2386_v8 }
 0x2e6   : > { %2403 = vmatpush.msra.mxu2 %v2385_v35 }
 0x2e8   : > { %2404 = vmatpush.msra.mxu2 %v2384_v53 }
 0x2ea   : > { %2405 = vmatpush.msra.mxu2 %v2383_v1 }
 0x2ec   : > { %2406 = vmatpush.msra.mxu2 %v2382_v3 }
 0x2ee   : > { %2407 = vmatpush.msra.mxu2 %v2381_v60 }
 0x2f0   : > { %2408 = vmatpush.msra.mxu2 %v2380_v26 }
 0x2f1   : > { %2697 = vmatmul.msk.f32.vlgmr.msra.gmra.mxu2 %vm2389_vm11, %v2388_v9 }
 0x2f2   : > { %2436 = vmatpush.msrb.mxu2 %v2416_v62 }
 0x2f4   : > { %2437 = vmatpush.msrb.mxu2 %v2415_v32 }
 0x2f6   : > { %2438 = vmatpush.msrb.mxu2 %v2414_v34 }
 0x2f8   : > { %2439 = vmatpush.msrb.mxu2 %v2413_v36 }
 0x2fa   : > { %2486 = vmatpush.msra.mxu2 %v2466_v20 }
 0x2fc   : > { %2487 = vmatpush.msra.mxu2 %v2465_v14 }
 0x2fe   : > { %2488 = vmatpush.msra.mxu2 %v2464_v24 }
 0x300   : > { %2489 = vmatpush.msra.mxu2 %v2463_v48 }
 0x374   : > { %v2410_v54 = vpop.f32.mrf.mxu2 }
 0x375   : > { %2698 = vmatmul.msk.f32.vlgmr.msrb.gmra.mxu2 %vm818_vm2, %v2410_v54 }
 0x3f8   : > { %v2441_v23 = vpop.f32.mrf.mxu2 }
 0x3f9   : > { %v2442_v55 = vadd.f32 %v2761_v41, %v2441_v23 }
 0x3fb   : > { %v2447_v59 = vand.u32 2147483647, %v2442_v55  ;;  %v2444_v5 = vmax.f32 %v2442_v55, 0.0  ;;  %vm2445_vm13 = vcmp.ne.f32.partialorder %v2442_v55, %v2442_v55 }
 0x3fd   : > { %v2448_v27 = vsub.f32 0.0, %v2447_v59 }
 0x3ff   : > { %v2449_v25 = vmul.f32 1.442695, %v2448_v27 }
 0x401   : > { %2795 = vpow2.f32 %v2449_v25 }
 0x407   : > { %v2796_v40 = vpop.eup %2795 }
 0x408   : > { %v2451_v29 = vadd.f32 1.0, %v2796_v40  ;;  %v2454_v38 = vmul.f32 -0.5, %v2796_v40  ;;  %v2457_v57 = vand.u32 2147483647, %v2796_v40 }
 0x40a   : > { %2797 = vlog2.f32 %v2451_v29  ;;  %v2455_v16 = vadd.f32 1.0, %v2454_v38  ;;  %vm2458_vm12 = vcmp.lt.f32.partialorder %v2457_v57, 0.0004427343 }
 0x40c   : > { %v2456_v7 = vmul.f32 %v2796_v40, %v2455_v16 }
 0x410   : > { %v2798_v6 = vpop.eup %2797 }
 0x411   : > { %v2453_v31 = vmul.f32 0.6931472, %v2798_v6 }
 0x413   : > { %v2459_v10 = vsel %vm2458_vm12, %v2456_v7, %v2453_v31 }
 0x414   : > { %v2460_v44 = vadd.f32 %v2459_v10, %v2444_v5 }
 0x416   : > { %v2461_v63 = vsel %vm2445_vm13, %v2442_v55, %v2460_v44 }
 0x417   : > { %v2699_v50 = vadd.f32 -0.6931472, %v2461_v63 }
 0x419   : > { %2700 = vmatmul.msk.f32.vlgmr.msra.gmra.mxu2 %vm818_vm2, %v2699_v50 }
 0x49c   : > { %v2491_v45 = vpop.f32.mrf.mxu2 }
 0x49d   : > { %v2492_v52 = vadd.f32 %v2762_v11, %v2491_v45 }
 0x49f   : > { %2494 = vst [vmem:[%s549_s16] sm:$0xff] %v2492_v52 }
 0x4a0   : > { %2830 = shalt.err (!%p2827_p4)
}
 0x4a1   : > { %2709 = dma.vmem_to_hbm [thread:$0]  (%p2993_p5), %s2509_s20, 128, %s2511_s0, %s2496_s2  }
 0x4a2 PF: > { %p2715_p7 = scmp.ge.s32.totalorder %s2865_s21, 2  ;;  %s2522_s26 = sand.u32 1, %s2853_s18  }
 0x4a3   : > { %s2523_s23 = scalar_lea.sflag [#allocation3], %s2522_s26 }
 0x4a4   : > { %p2712_p8 = pnand %p2715_p7, %p2997_p6 }
 0x4a6   : > { %p2713_p9 = pneg %p2712_p8 }
 0x4a8   : > { %2848 = dma.done.wait (%p2713_p9), %s2523_s23, 128  }
 0x4a9   : > { %2850 = vsyncadd (%p2713_p9), %s2523_s23, 4294967168  ;;  %s4351_s3 = sld [smem:[#allocation5_spill]]  ;;  %p25_p10 = scmp.ge.s32.totalorder %s2980_s24, 4  }
 0x4aa   : > { %s4352_s20 = sld [smem:[#allocation6_spill]]  ;;  %s4353_s18 = smov %s2857_s19 }
 0x4ab   : > { %s4355_s21 = smov %s2980_s24  ;;  %27 = sbr.rel (!%p25_p10) target bundleno = 9 (0x9), region = 127 }
 0x4af   : > { %s4354_s19 = smov %s4351_s3 }
 0x4b0   :  { %2529 = vsyncpa [#allocation3], 1 }
 0x4b1   :  { %2531 = vsyncpa [#allocation3 + $0x1], 1 }

</bundles_post_ra>
